<compile_context>
chip_gen: v7x
topology: tpu7x:2x2x1
jax: 0.10.0
libtpu: 0.0.40
codegen_flags: <defaults>
</compile_context>

<pallas_src>
import math
from functools import partial

import jax
import jax.numpy as jnp
from jax import lax
from jax.experimental import pallas as pl
from jax.experimental.pallas import tpu as pltpu

D_IN = 768
D_OUT = 4

# Below this batch size a fused XLA linear+sigmoid beats the fixed pallas_call
# launch + single tiny DMA.
_PALLAS_MIN_BATCH = 2048


def _valence_proj_kernel(x_ref, w_ref, b_ref, out_ref):
    # x_ref: (TB, 768) VMEM (f32 or bf16, native dtype — no cast),
    # w_ref: (768, 4) VMEM (K, N layout, pre-transposed in the wrapper),
    # b_ref: (1, 4) f32 VMEM.
    y = lax.dot_general(
        x_ref[...], w_ref[...],
        dimension_numbers=(((1,), (0,)), ((), ())),
        precision=lax.Precision.HIGHEST,          # f32 parity; MXU time is noise here
        preferred_element_type=jnp.float32,
    )
    out_ref[...] = jax.nn.sigmoid(y + b_ref[...])


def _choose_batch_tile(B: int, itemsize: int) -> int:
    # ~6 MiB of x per pipeline buffer: 2048 rows f32, 4096 rows bf16.
    # Double-buffered that is ~12 MiB — within the recommended range on
    # v5e/v6e/v7x once vmem_limit_bytes is set explicitly (see wrapper).
    max_tb = 2048 if itemsize >= 4 else 4096
    if B >= max_tb:
        return max_tb
    # Round small batches up to the sublane multiple (8) so the block shape
    # satisfies the (8, 128) constraint; Pallas masks the extra rows.
    return max(8, ((B + 7) // 8) * 8)


def _valence_arousal_projection_pallas(embeddings, weight, bias):
    """embeddings: (B, 768) f32/bf16, weight: (4, 768), bias: (4,) -> (B, 4) f32."""
    B = embeddings.shape[0]
    x_itemsize = jnp.dtype(embeddings.dtype).itemsize
    TB = _choose_batch_tile(B, x_itemsize)
    grid = (pl.cdiv(B, TB),)

    # One-time wrapper-side relayout/cast: (4, 768) -> (768, 4) in the compute
    # dtype of x (bf16 only if the data is bf16 end-to-end, else f32).
    w_kn = jnp.transpose(weight).astype(embeddings.dtype)      # (768, 4)
    bias2d = bias.reshape(1, D_OUT).astype(jnp.float32)

    cost = pl.CostEstimate(
        flops=2 * B * D_IN * D_OUT,
        transcendentals=B * D_OUT,
        bytes_accessed=(B * D_IN * x_itemsize          # x read (the roofline)
                        + D_IN * D_OUT * x_itemsize    # weight read
                        + D_OUT * 4                    # bias read
                        + B * D_OUT * 4),              # output write
    )

    # Explicit scoped-VMEM budget: double-buffered x + double-buffered out +
    # resident weight/bias + headroom. Stays well under every chip's physical
    # VMEM (64 MiB/TC on v7x, 128 MiB elsewhere).
    vmem_limit = int(2 * TB * D_IN * x_itemsize
                     + 2 * TB * D_OUT * 4
                     + D_IN * D_OUT * x_itemsize
                     + (8 << 20))

    return pl.pallas_call(
        _valence_proj_kernel,
        out_shape=jax.ShapeDtypeStruct((B, D_OUT), jnp.float32),
        grid_spec=pltpu.PrefetchScalarGridSpec(
            num_scalar_prefetch=0,
            grid=grid,
            in_specs=[
                pl.BlockSpec((TB, D_IN), lambda i: (i, 0)),      # x: tiled on batch
                pl.BlockSpec((D_IN, D_OUT), lambda i: (0, 0)),   # weight: resident
                pl.BlockSpec((1, D_OUT), lambda i: (0, 0)),      # bias: resident
            ],
            out_specs=pl.BlockSpec((TB, D_OUT), lambda i: (i, 0)),
        ),
        compiler_params=pltpu.CompilerParams(
            dimension_semantics=("parallel",),
            vmem_limit_bytes=vmem_limit,
        ),
        cost_estimate=cost,
    )(embeddings, w_kn, bias2d)


def valence_arousal_projection(embeddings, weight, bias, *, force_pallas=False):
    """sigmoid(embeddings @ weight.T + bias) -> (B, 4) f32.

    Small batches use a fused XLA path (launch overhead dominates the kernel);
    large batches stream through the Pallas kernel.
    """
    B = embeddings.shape[0]
    if B < _PALLAS_MIN_BATCH and not force_pallas:
        y = jnp.dot(embeddings.astype(jnp.float32),
                    jnp.transpose(weight).astype(jnp.float32),
                    precision=lax.Precision.HIGHEST)
        return jax.nn.sigmoid(y + bias.astype(jnp.float32))
    return _valence_arousal_projection_pallas(embeddings, weight, bias)


def emotional_embedder_forward(embeddings, weight, bias, *, force_pallas=False):
    """Mirror of EmotionalEmbedder.forward.

    embeddings: (B, 768)   (stand-in for get_embeddings(text_input); f32 or bf16)
    weight:     (4, 768)   (PyTorch nn.Linear weight layout)
    bias:       (4,)
    """
    # TODO(synk): get_embeddings(text_input) is an external text-embedding API
    # call with no Pallas equivalent; embeddings are taken directly as input.
    # (Best case per review: fuse this 768x4 projection as an epilogue of the
    # op producing the embeddings, while they are still in VMEM.)
    valence_arousal = valence_arousal_projection(
        embeddings, weight, bias, force_pallas=force_pallas)
    return {
        "semantic_embedding": embeddings,
        "valence": valence_arousal[:, 0],
        "arousal": valence_arousal[:, 1],
    }


def init_params(key):
    kw, kb = jax.random.split(key)
    # PyTorch: weight.data.normal_(mean=0.0, std=0.02)
    weight = 0.02 * jax.random.normal(kw, (D_OUT, D_IN), dtype=jnp.float32)
    # PyTorch nn.Linear default bias init: U(-1/sqrt(fan_in), 1/sqrt(fan_in))
    bound = 1.0 / math.sqrt(D_IN)
    bias = jax.random.uniform(
        kb, (D_OUT,), minval=-bound, maxval=bound, dtype=jnp.float32
    )
    return weight, bias


if __name__ == "__main__":
    key = jax.random.PRNGKey(0)
    k_x, k_p = jax.random.split(key)

    B = 16  # small batch of "text inputs"; D_IN=768 is fixed by the module
    embeddings = jax.random.normal(k_x, (B, D_IN), dtype=jnp.float32)
    weight, bias = init_params(k_p)

    # Exercise the Pallas kernel path explicitly.
    out = emotional_embedder_forward(embeddings, weight, bias, force_pallas=True)
    jax.block_until_ready(out)

    assert out["semantic_embedding"].shape == (B, D_IN)
    assert out["valence"].shape == (B,)
    assert out["arousal"].shape == (B,)

    # f32-parity reference (no bf16 downcast anymore).
    ref = jax.nn.sigmoid(embeddings @ weight.T + bias)
    assert jnp.allclose(out["valence"], ref[:, 0], atol=1e-4), "valence mismatch"
    assert jnp.allclose(out["arousal"], ref[:, 1], atol=1e-4), "arousal mismatch"

    # The auto-dispatch path (fused XLA for small B) must agree with the kernel.
    out_auto = emotional_embedder_forward(embeddings, weight, bias)
    jax.block_until_ready(out_auto)
    assert jnp.allclose(out_auto["valence"], out["valence"], atol=1e-4)
    assert jnp.allclose(out_auto["arousal"], out["arousal"], atol=1e-4)

    print("KERNEL_OK")
</pallas_src>

<mosaic_0001>
module attributes {stable_mosaic.version = 11 : i64} {
  func.func @_valence_proj_kernel(%arg0: i32, %arg1: memref<16x768xf32, #tpu.memory_space<vmem>>, %arg2: memref<768x4xf32, #tpu.memory_space<vmem>>, %arg3: memref<1x4xf32, #tpu.memory_space<vmem>>, %arg4: memref<16x4xf32, #tpu.memory_space<vmem>>) attributes {dimension_semantics = [#tpu.dimension_semantics<parallel>], iteration_bounds = array<i64: 1>, scalar_prefetch = 0 : i64, scratch_operands = 0 : i64, tpu.core_type = #tpu.core_type<tc>, window_params = [{transform_indices = @transform_0, window_bounds = array<i64: 16, 768>}, {pipeline_mode = #tpu.pipeline_mode<synchronous>, transform_indices = @transform_1, window_bounds = array<i64: 768, 4>}, {pipeline_mode = #tpu.pipeline_mode<synchronous>, transform_indices = @transform_2, window_bounds = array<i64: 1, 4>}, {transform_indices = @transform_3, window_bounds = array<i64: 16, 4>}]} {
    %c0 = arith.constant 0 : index
    %c0_0 = arith.constant 0 : index
    %0 = vector.load %arg1[%c0, %c0_0] : memref<16x768xf32, #tpu.memory_space<vmem>>, vector<16x768xf32>
    %c0_1 = arith.constant 0 : index
    %c0_2 = arith.constant 0 : index
    %1 = vector.load %arg2[%c0_1, %c0_2] : memref<768x4xf32, #tpu.memory_space<vmem>>, vector<768x4xf32>
    %cst = arith.constant dense<0.000000e+00> : vector<16x4xf32>
    %2 = tpu.matmul %0, %1, %cst {dimension_numbers = #tpu.dot_dimension_numbers<[1], [0], [0], [1], [0, 0, 1, 1], [], []>, precision = #tpu.contract_precision<fp32>} : vector<16x768xf32>, vector<768x4xf32>, vector<16x4xf32> -> vector<16x4xf32>
    %c0_3 = arith.constant 0 : index
    %c0_4 = arith.constant 0 : index
    %3 = vector.load %arg3[%c0_3, %c0_4] : memref<1x4xf32, #tpu.memory_space<vmem>>, vector<1x4xf32>
    %4 = vector.broadcast %3 : vector<1x4xf32> to vector<16x4xf32>
    %5 = arith.addf %2, %4 : vector<16x4xf32>
    %6 = arith.negf %5 : vector<16x4xf32>
    %7 = math.exp %6 : vector<16x4xf32>
    %cst_5 = arith.constant 1.000000e+00 : f32
    %8 = vector.broadcast %cst_5 : f32 to vector<16x4xf32>
    %9 = arith.addf %8, %7 : vector<16x4xf32>
    %10 = arith.divf %8, %9 : vector<16x4xf32>
    %c0_6 = arith.constant 0 : index
    %c0_7 = arith.constant 0 : index
    %11 = vector.load %arg4[%c0_6, %c0_7] : memref<16x4xf32, #tpu.memory_space<vmem>>, vector<16x4xf32>
    tpu.vector_store %arg4[%c0_6, %c0_7], %10 {strides = array<i32>} : memref<16x4xf32, #tpu.memory_space<vmem>>, vector<16x4xf32>,
    return
  }
  func.func @transform_0(%arg0: i32) -> (i32, i32) {
    %c0_i32 = arith.constant 0 : i32
    %c0_i32_0 = arith.constant 0 : i32
    return %arg0, %c0_i32 : i32, i32
  }
  func.func @transform_1(%arg0: i32) -> (i32, i32) {
    %c0_i32 = arith.constant 0 : i32
    %c0_i32_0 = arith.constant 0 : i32
    %c0_i32_1 = arith.constant 0 : i32
    return %c0_i32, %c0_i32_0 : i32, i32
  }
  func.func @transform_2(%arg0: i32) -> (i32, i32) {
    %c0_i32 = arith.constant 0 : i32
    %c0_i32_0 = arith.constant 0 : i32
    %c0_i32_1 = arith.constant 0 : i32
    return %c0_i32, %c0_i32_0 : i32, i32
  }
  func.func @transform_3(%arg0: i32) -> (i32, i32) {
    %c0_i32 = arith.constant 0 : i32
    %c0_i32_0 = arith.constant 0 : i32
    return %arg0, %c0_i32 : i32, i32
  }
}

</mosaic_0001>

<bundles_post_ra>
// kernel: tpu_custom_call.1
= control target key start
LH: loop header
LB: loop body
LE: loop exit
PB: predicated region body
PF: predicated region fallthrough
CT: control target
= control target key end

     0   :  { %vm2895_vm0 = vcmask 31744   ;;  %s5952_s1 = inlined_call_operand.vmem [shape: f32[768,4], index: 1, kind: input, shape index: {}]   ;;  %s5953_s0 = inlined_call_operand.vmem [shape: f32[16,768], index: 0, kind: input, shape index: {}]   ;;  %s5954_s2 = inlined_call_operand.vmem [shape: f32[1,4], index: 2, kind: input, shape index: {}]   ;;  %s5955_s3 = inlined_call_operand.vmem [shape: f32[16,4], index: 3, kind: output, shape index: {}]  }
   0x1   :  { %v42_v0 = vld [vmem:[%s5952_s1 + $0x80] sm:$0xff]  ;;  %v43_v1 = vld [vmem:[%s5952_s1 + $0x88] sm:$0xff]  ;;  %v44_v7 = vld [vmem:[%s5952_s1 + $0x90] sm:$0xff] }
   0x2   :  { %v26_v2 = vld [vmem:[%s5952_s1] sm:$0xff]  ;;  %v178_v3 = vand.u32 4294901760, %v42_v0  ;;  %v181_v4 = vand.u32 4294901760, %v43_v1  ;;  %v27_v5 = vld [vmem:[%s5952_s1 + $0x8] sm:$0xff]  ;;  %v45_v8 = vld [vmem:[%s5952_s1 + $0x98] sm:$0xff]  ;;  %v184_v10 = vand.u32 4294901760, %v44_v7 }
   0x3   :  { %v130_v6 = vand.u32 4294901760, %v26_v2  ;;  %v133_v9 = vand.u32 4294901760, %v27_v5  ;;  %v187_v11 = vand.u32 4294901760, %v45_v8  ;;  %v28_v12 = vld [vmem:[%s5952_s1 + $0x10] sm:$0xff]  ;;  %v29_v13 = vld [vmem:[%s5952_s1 + $0x18] sm:$0xff]  ;;  %v46_v18 = vld [vmem:[%s5952_s1 + $0xa0] sm:$0xff] }
   0x4   :  { %v4217_v14 = vpack.c.bf16 %v181_v4, %v178_v3  ;;  %v136_v16 = vand.u32 4294901760, %v28_v12  ;;  %v139_v17 = vand.u32 4294901760, %v29_v13  ;;  %v47_v19 = vld [vmem:[%s5952_s1 + $0xa8] sm:$0xff]  ;;  %v30_v23 = vld [vmem:[%s5952_s1 + $0x20] sm:$0xff]  ;;  %v4240_v25 = vsub.f32 %v44_v7, %v184_v10  ;;  %v48_v37 = vld [vmem:[%s5952_s1 + $0xb0] sm:$0xff] }
   0x5   :  { %v4219_v15 = vsub.f32 %v26_v2, %v130_v6  ;;  %v4227_v20 = vpack.c.bf16 %v133_v9, %v130_v6  ;;  %v4229_v21 = vsub.f32 %v27_v5, %v133_v9  ;;  %v4231_v22 = vpack.c.bf16 %v187_v11, %v184_v10  ;;  %v31_v24 = vld [vmem:[%s5952_s1 + $0x28] sm:$0xff]  ;;  %v49_v42 = vld [vmem:[%s5952_s1 + $0xb8] sm:$0xff]  ;;  %v32_v55 = vld [vmem:[%s5952_s1 + $0x30] sm:$0xff] }
   0x6   :  { %3590 = vmatprep.subr.bf16.mxu0 %v4217_v14  ;;  %v4242_v26 = vsub.f32 %v45_v8, %v187_v11  ;;  %v4244_v27 = vpack.c.bf16 %v139_v17, %v136_v16  ;;  %v4246_v28 = vsub.f32 %v28_v12, %v136_v16  ;;  %v190_v29 = vand.u32 4294901760, %v46_v18  ;;  %v33_v56 = vld [vmem:[%s5952_s1 + $0x38] sm:$0xff]  ;;  %v50_v5 = vld [vmem:[%s5952_s1 + $0xc0] sm:$0xff]  ;;  %v51_v6 = vld [vmem:[%s5952_s1 + $0xc8] sm:$0xff] }
   0x7   :  { %3592 = vmatpush3.bf16.msra.mxu0 %v4227_v20  ;;  %v193_v30 = vand.u32 4294901760, %v47_v19  ;;  %v4249_v31 = vsub.f32 %v42_v0, %v178_v3  ;;  %v4251_v32 = vsub.f32 %v43_v1, %v181_v4  ;;  %v142_v33 = vand.u32 4294901760, %v30_v23  ;;  %v34_v11 = vld [vmem:[%s5952_s1 + $0x40] sm:$0xff] }
   0x8   :  { %3594 = vmatprep.subr.bf16.mxu0 %v4231_v22  ;;  %v145_v34 = vand.u32 4294901760, %v31_v24  ;;  %v5972_v35 = vand.u32 4294901760, %v4219_v15  ;;  %v5971_v36 = vand.u32 4294901760, %v4229_v21  ;;  %v4259_v38 = vsub.f32 %v29_v13, %v139_v17 }
   0x9   :  { %v4261_v39 = vpack.c.bf16 %v193_v30, %v190_v29  ;;  %v4263_v40 = vsub.f32 %v46_v18, %v190_v29  ;;  %v5977_v41 = vand.u32 4294901760, %v4249_v31  ;;  %v4269_v43 = vsub.f32 %v47_v19, %v193_v30  ;;  %v35_v29 = vld [vmem:[%s5952_s1 + $0x48] sm:$0xff] }
   0xa   :  { %v5974_v44 = vand.u32 4294901760, %v4251_v32  ;;  %v4272_v45 = vpack.c.bf16 %v145_v34, %v142_v33  ;;  %v4274_v46 = vsub.f32 %v30_v23, %v142_v33  ;;  %v260_v48 = vsub.f32 %v4219_v15, %v5972_v35 }
   0xb   :  { %3596 = vmatpush3.bf16.msra.mxu0 %v4244_v27  ;;  %v372_v47 = vsub.f32 %v4249_v31, %v5977_v41  ;;  %v267_v49 = vsub.f32 %v4229_v21, %v5971_v36  ;;  %v196_v50 = vand.u32 4294901760, %v48_v37  ;;  %v199_v52 = vand.u32 4294901760, %v49_v42 }
   0xc   :  { %3598 = vmatprep.subr.bf16.mxu0 %v4261_v39  ;;  %v379_v51 = vsub.f32 %v4251_v32, %v5974_v44  ;;  %v5969_v53 = vand.u32 4294901760, %v4240_v25  ;;  %v5968_v54 = vand.u32 4294901760, %v4242_v26  ;;  %v4298_v58 = vsub.f32 %v31_v24, %v145_v34 }
   0xd   :  { %v373_v57 = vand.u32 4294901760, %v372_v47  ;;  %v261_v59 = vand.u32 4294901760, %v260_v48  ;;  %v268_v60 = vand.u32 4294901760, %v267_v49  ;;  %v4300_v62 = vpack.c.bf16 %v199_v52, %v196_v50 }
   0xe   :  { %v380_v61 = vand.u32 4294901760, %v379_v51  ;;  %v4302_v63 = vsub.f32 %v48_v37, %v196_v50  ;;  %v386_v0 = vsub.f32 %v4240_v25, %v5969_v53  ;;  %v393_v2 = vsub.f32 %v4242_v26, %v5968_v54 }
   0xf   :  { %3600 = vmatpush3.bf16.msra.mxu0 %v4272_v45  ;;  %v3623_v1 = vpack.c.bf16 %v268_v60, %v261_v59  ;;  %v148_v3 = vand.u32 4294901760, %v32_v55  ;;  %v151_v4 = vand.u32 4294901760, %v33_v56  ;;  %v5967_v9 = vand.u32 4294901760, %v4246_v28 }
  0x10   :  { %v3621_v7 = vpack.c.bf16 %v380_v61, %v373_v57  ;;  %3602 = vmatprep.subr.bf16.mxu0 %v4300_v62  ;;  %v387_v8 = vand.u32 4294901760, %v386_v0  ;;  %v5964_v10 = vand.u32 4294901760, %v4259_v38  ;;  %v4323_v12 = vsub.f32 %v49_v42, %v199_v52  ;;  %v53_v57 = vld [vmem:[%s5952_s1 + $0xd8] sm:$0xff] }
  0x11   :  { %v394_v13 = vand.u32 4294901760, %v393_v2  ;;  %v4325_v16 = vpack.c.bf16 %v151_v4, %v148_v3  ;;  %v4327_v17 = vsub.f32 %v32_v55, %v148_v3  ;;  %v274_v18 = vsub.f32 %v4246_v28, %v5967_v9 }
  0x12   :  { %3622 = vmatprep.subr.bf16.mxu1 %v3621_v7  ;;  %v281_v19 = vsub.f32 %v4259_v38, %v5964_v10  ;;  %v202_v23 = vand.u32 4294901760, %v50_v5  ;;  %v205_v24 = vand.u32 4294901760, %v51_v6  ;;  %v5962_v33 = vand.u32 4294901760, %v4263_v40 }
  0x13   :  { %3624 = vmatpush3.bf16.msra.mxu1 %v3623_v1  ;;  %v3625_v30 = vpack.c.bf16 %v394_v13, %v387_v8  ;;  %3604 = vmatpush3.bf16.msra.mxu0 %v4325_v16  ;;  %v5961_v34 = vand.u32 4294901760, %v4269_v43  ;;  %v154_v37 = vand.u32 4294901760, %v34_v11  ;;  %v4341_v42 = vsub.f32 %v33_v56, %v151_v4  ;;  %v52_v56 = vld [vmem:[%s5952_s1 + $0xd0] sm:$0xff] }
  0x14   :  { %v275_v47 = vand.u32 4294901760, %v274_v18  ;;  %v282_v48 = vand.u32 4294901760, %v281_v19  ;;  %v4343_v49 = vpack.c.bf16 %v205_v24, %v202_v23  ;;  %v4345_v50 = vsub.f32 %v50_v5, %v202_v23  ;;  %v36_v1 = vld [vmem:[%s5952_s1 + $0x50] sm:$0xff]  ;;  %v37_v18 = vld [vmem:[%s5952_s1 + $0x58] sm:$0xff] }
  0x15   :  { %3626 = vmatprep.subr.bf16.mxu1 %v3625_v30  ;;  %v400_v51 = vsub.f32 %v4263_v40, %v5962_v33  ;;  %v407_v52 = vsub.f32 %v4269_v43, %v5961_v34  ;;  %v157_v55 = vand.u32 4294901760, %v35_v29  ;;  %v4360_v60 = vsub.f32 %v51_v6, %v205_v24 }
  0x16   :  { %v3627_v59 = vpack.c.bf16 %v282_v48, %v275_v47  ;;  %3606 = vmatprep.subr.bf16.mxu0 %v4343_v49  ;;  %v5959_v61 = vand.u32 4294901760, %v4274_v46  ;;  %v5958_v0 = vand.u32 4294901760, %v4298_v58  ;;  %v4369_v5 = vsub.f32 %v34_v11, %v154_v37 }
  0x17   :  { %v401_v2 = vand.u32 4294901760, %v400_v51  ;;  %v408_v3 = vand.u32 4294901760, %v407_v52  ;;  %v4367_v4 = vpack.c.bf16 %v157_v55, %v154_v37  ;;  %v208_v8 = vand.u32 4294901760, %v52_v56 }
  0x18   :  { %3628 = vmatpush3.bf16.msra.mxu1 %v3627_v59  ;;  %v288_v6 = vsub.f32 %v4274_v46, %v5959_v61  ;;  %v295_v7 = vsub.f32 %v4298_v58, %v5958_v0  ;;  %v211_v13 = vand.u32 4294901760, %v53_v57  ;;  %v5957_v11 = vand.u32 4294901760, %v4302_v63 }
  0x19   :  { %v3629_v19 = vpack.c.bf16 %v408_v3, %v401_v2  ;;  %3608 = vmatpush3.bf16.msra.mxu0 %v4367_v4  ;;  %v5956_v23 = vand.u32 4294901760, %v4323_v12  ;;  %v160_v24 = vand.u32 4294901760, %v36_v1  ;;  %v4383_v30 = vsub.f32 %v35_v29, %v157_v55  ;;  %v54_v29 = vld [vmem:[%s5952_s1 + $0xe0] sm:$0xff]  ;;  %v55_v55 = vld [vmem:[%s5952_s1 + $0xe8] sm:$0xff] }
  0x1a   :  { %v289_v37 = vand.u32 4294901760, %v288_v6  ;;  %v296_v47 = vand.u32 4294901760, %v295_v7  ;;  %v4385_v48 = vpack.c.bf16 %v211_v13, %v208_v8  ;;  %v4387_v51 = vsub.f32 %v52_v56, %v208_v8  ;;  %v38_v8 = vld [vmem:[%s5952_s1 + $0x60] sm:$0xff] }
  0x1b   :  { %3630 = vmatprep.subr.bf16.mxu1 %v3629_v19  ;;  %v414_v52 = vsub.f32 %v4302_v63, %v5957_v11  ;;  %v421_v59 = vsub.f32 %v4323_v12, %v5956_v23  ;;  %v163_v2 = vand.u32 4294901760, %v37_v18  ;;  %v4402_v56 = vsub.f32 %v53_v57, %v211_v13 }
  0x1c   :  { %6123 = vst [vmem:[#allocation2_spill] sm:$0xff] %v4385_v48  ;;  %v3631_v3 = vpack.c.bf16 %v296_v47, %v289_v37  ;;  %3610 = vmatprep.subr.bf16.mxu0 %v4385_v48  ;;  %v5960_v6 = vand.u32 4294901760, %v4327_v17  ;;  %v5963_v7 = vand.u32 4294901760, %v4341_v42  ;;  %v4411_v0 = vsub.f32 %v36_v1, %v160_v24 }
  0x1d   :  { %v415_v19 = vand.u32 4294901760, %v414_v52  ;;  %v422_v23 = vand.u32 4294901760, %v421_v59  ;;  %v4409_v11 = vpack.c.bf16 %v163_v2, %v160_v24  ;;  %v214_v37 = vand.u32 4294901760, %v54_v29  ;;  %v39_v52 = vld [vmem:[%s5952_s1 + $0x68] sm:$0xff] }
  0x1e   :  { %3632 = vmatpush3.bf16.msra.mxu1 %v3631_v3  ;;  %v302_v57 = vsub.f32 %v4327_v17, %v5960_v6  ;;  %v309_v13 = vsub.f32 %v4341_v42, %v5963_v7  ;;  %v217_v47 = vand.u32 4294901760, %v55_v55  ;;  %v5966_v1 = vand.u32 4294901760, %v4345_v50 }
  0x1f   :  { %6124 = vst [vmem:[#allocation3_spill] sm:$0xff] %v4409_v11  ;;  %v3633_v59 = vpack.c.bf16 %v422_v23, %v415_v19  ;;  %3612 = vmatpush3.bf16.msra.mxu0 %v4409_v11  ;;  %v5965_v24 = vand.u32 4294901760, %v4360_v60  ;;  %v166_v3 = vand.u32 4294901760, %v38_v8  ;;  %v4425_v61 = vsub.f32 %v37_v18, %v163_v2  ;;  %v56_v18 = vld [vmem:[%s5952_s1 + $0xf0] sm:$0xff]  ;;  %v57_v2 = vld [vmem:[%s5952_s1 + $0xf8] sm:$0xff] }
  0x20   :  { %v303_v6 = vand.u32 4294901760, %v302_v57  ;;  %v310_v34 = vand.u32 4294901760, %v309_v13  ;;  %v4427_v33 = vpack.c.bf16 %v217_v47, %v214_v37  ;;  %v4429_v7 = vsub.f32 %v54_v29, %v214_v37 }
  0x21   :  { %3634 = vmatprep.subr.bf16.mxu1 %v3633_v59  ;;  %v428_v23 = vsub.f32 %v4345_v50, %v5966_v1  ;;  %v435_v19 = vsub.f32 %v4360_v60, %v5965_v24  ;;  %v169_v10 = vand.u32 4294901760, %v39_v52  ;;  %v4444_v29 = vsub.f32 %v55_v55, %v217_v47  ;;  %v40_v59 = vld [vmem:[%s5952_s1 + $0x70] sm:$0xff] }
  0x22   :  { %6125 = vst [vmem:[#allocation4_spill] sm:$0xff] %v4427_v33  ;;  %v3635_v57 = vpack.c.bf16 %v310_v34, %v303_v6  ;;  %3614 = vmatprep.subr.bf16.mxu0 %v4427_v33  ;;  %v5970_v13 = vand.u32 4294901760, %v4369_v5  ;;  %v5973_v37 = vand.u32 4294901760, %v4383_v30  ;;  %v4453_v54 = vsub.f32 %v38_v8, %v166_v3 }
  0x23   :  { %v429_v24 = vand.u32 4294901760, %v428_v23  ;;  %v436_v1 = vand.u32 4294901760, %v435_v19  ;;  %v4451_v9 = vpack.c.bf16 %v169_v10, %v166_v3  ;;  %v220_v6 = vand.u32 4294901760, %v56_v18  ;;  %v41_v23 = vld [vmem:[%s5952_s1 + $0x78] sm:$0xff] }
  0x24   :  { %3636 = vmatpush3.bf16.msra.mxu1 %v3635_v57  ;;  %v316_v34 = vsub.f32 %v4369_v5, %v5970_v13  ;;  %v323_v55 = vsub.f32 %v4383_v30, %v5973_v37  ;;  %v223_v47 = vand.u32 4294901760, %v57_v2  ;;  %v5976_v8 = vand.u32 4294901760, %v4387_v51 }
  0x25   :  { %6126 = vst [vmem:[#allocation5_spill] sm:$0xff] %v4451_v9  ;;  %v3637_v19 = vpack.c.bf16 %v436_v1, %v429_v24  ;;  %3616 = vmatpush3.bf16.msra.mxu0 %v4451_v9  ;;  %v5975_v3 = vand.u32 4294901760, %v4402_v56  ;;  %v172_v57 = vand.u32 4294901760, %v40_v59  ;;  %v4467_v53 = vsub.f32 %v39_v52, %v169_v10  ;;  %v15_v10 = vld [vmem:[%s5953_s0 + $0x8] sm:$0xff] }
  0x26   :  { %v317_v13 = vand.u32 4294901760, %v316_v34  ;;  %v324_v36 = vand.u32 4294901760, %v323_v55  ;;  %v4469_v35 = vpack.c.bf16 %v223_v47, %v220_v6  ;;  %v4471_v37 = vsub.f32 %v56_v18, %v220_v6  ;;  %v14_v6 = vld [vmem:[%s5953_s0] sm:$0xff] }
  0x27   :  { %3638 = vmatprep.subr.bf16.mxu1 %v3637_v19  ;;  %v442_v1 = vsub.f32 %v4387_v51, %v5976_v8  ;;  %v449_v24 = vsub.f32 %v4402_v56, %v5975_v3  ;;  %v175_v44 = vand.u32 4294901760, %v41_v23  ;;  %v4483_v34 = vsub.f32 %v57_v2, %v223_v47 }
  0x28   :  { %6127 = vst [vmem:[#allocation6_spill] sm:$0xff] %v4469_v35  ;;  %v3639_v52 = vpack.c.bf16 %v324_v36, %v317_v13  ;;  %3618 = vmatprep.subr.bf16.mxu0 %v4469_v35  ;;  %v5980_v18 = vand.u32 4294901760, %v4411_v0  ;;  %v5981_v55 = vand.u32 4294901760, %v4425_v61  ;;  %v4492_v41 = vsub.f32 %v40_v59, %v172_v57 }
  0x29   :  { %v443_v19 = vand.u32 4294901760, %v442_v1  ;;  %v450_v3 = vand.u32 4294901760, %v449_v24  ;;  %v4490_v8 = vpack.c.bf16 %v175_v44, %v172_v57  ;;  %v4500_v13 = vand.u32 4294901760, %v15_v10 }
  0x2a   :  { %3640 = vmatpush3.bf16.msra.mxu1 %v3639_v52  ;;  %v330_v36 = vsub.f32 %v4411_v0, %v5980_v18  ;;  %v337_v2 = vsub.f32 %v4425_v61, %v5981_v55  ;;  %v5984_v47 = vand.u32 4294901760, %v4429_v7  ;;  %v5990_v1 = vand.u32 4294901760, %v4444_v29 }
  0x2b   :  { %6128 = vst [vmem:[#allocation7_spill] sm:$0xff] %v4490_v8  ;;  %6129 = vst [vmem:[#allocation8_spill] sm:$0xff] %v4500_v13  ;;  %v3641_v35 = vpack.c.bf16 %v450_v3, %v443_v19  ;;  %3620 = vmatpush3.bf16.msra.mxu0 %v4490_v8  ;;  %v3653_v59 = vpack.c.bf16 %v4251_v32, %v4249_v31  ;;  %v4507_v57 = vand.u32 4294901760, %v14_v6  ;;  %481 = vmatprep.mubr.f32.mxu1 %v4500_v13 }
  0x2c   :  { %v331_v24 = vand.u32 4294901760, %v330_v36  ;;  %v338_v52 = vand.u32 4294901760, %v337_v2  ;;  %v4510_v18 = vsub.f32 %v15_v10, %v4500_v13  ;;  %v456_v55 = vsub.f32 %v4429_v7, %v5984_v47 }
  0x2d   :  { %3642 = vmatprep.subr.bf16.mxu1 %v3641_v35  ;;  %v463_v3 = vsub.f32 %v4444_v29, %v5990_v1  ;;  %3654 = vmatprep.subr.bf16.mxu0 %v3653_v59  ;;  %v4520_v19 = vsub.f32 %v14_v6, %v4507_v57  ;;  %v5989_v36 = vand.u32 4294901760, %v4453_v54  ;;  %v5991_v10 = vand.u32 4294901760, %v4467_v53 }
  0x2e   :  { %v4524_v2 = vsub.f32 %v41_v23, %v175_v44  ;;  %v3643_v8 = vpack.c.bf16 %v338_v52, %v331_v24  ;;  %v5992_v47 = vand.u32 4294901760, %v4510_v18  ;;  %v457_v9 = vand.u32 4294901760, %v456_v55 }
  0x2f   :  { %6130 = vst [vmem:[#allocation9_spill] sm:$0xff] %v4520_v19  ;;  %v464_v13 = vand.u32 4294901760, %v463_v3  ;;  %v5995_v35 = vand.u32 4294901760, %v4520_v19  ;;  %v344_v59 = vsub.f32 %v4453_v54, %v5989_v36  ;;  %v351_v6 = vsub.f32 %v4467_v53, %v5991_v10 }
  0x30   :  { %3644 = vmatpush3.bf16.msra.mxu1 %v3643_v8  ;;  %v228_v44 = vsub.f32 %v4510_v18, %v5992_v47  ;;  %v3655_v23 = vpack.c.bf16 %v4229_v21, %v4219_v15  ;;  %v5996_v55 = vand.u32 4294901760, %v4471_v37  ;;  %v5997_v24 = vand.u32 4294901760, %v4483_v34 }
  0x31   :  { %v3645_v52 = vpack.c.bf16 %v464_v13, %v457_v9  ;;  %v234_v3 = vsub.f32 %v4520_v19, %v5995_v35  ;;  %v345_v36 = vand.u32 4294901760, %v344_v59  ;;  %v352_v1 = vand.u32 4294901760, %v351_v6  ;;  %v21_v9 = vld [vmem:[%s5953_s0 + $0x38] sm:$0xff] }
  0x32   :  { %v229_v10 = vand.u32 4294901760, %v228_v44  ;;  %v470_v8 = vsub.f32 %v4471_v37, %v5996_v55  ;;  %v477_v47 = vsub.f32 %v4483_v34, %v5997_v24  ;;  %v5999_v33 = vand.u32 4294901760, %v4492_v41 }
  0x33   :  { %3646 = vmatprep.subr.bf16.mxu1 %v3645_v52  ;;  %v235_v13 = vand.u32 4294901760, %v234_v3  ;;  %v3647_v35 = vpack.c.bf16 %v352_v1, %v345_v36  ;;  %v3657_v59 = vpack.c.bf16 %v4242_v26, %v4240_v25  ;;  %v5998_v6 = vand.u32 4294901760, %v4524_v2  ;;  %v20_v1 = vld [vmem:[%s5953_s0 + $0x30] sm:$0xff] }
  0x34   :  { %230 = vmatprep.mubr.f32.mxu0 %v229_v10  ;;  %v471_v44 = vand.u32 4294901760, %v470_v8  ;;  %v478_v55 = vand.u32 4294901760, %v477_v47  ;;  %v358_v24 = vsub.f32 %v4492_v41, %v5999_v33  ;;  %v4563_v3 = vand.u32 4294901760, %v21_v9 }
  0x35   :  { %236 = vmatmul.mubr.f32.vlgmr.msra.gmra.mrb[0].mxu0 %v235_v13  ;;  %3648 = vmatpush3.bf16.msra.mxu1 %v3647_v35  ;;  %v365_v52 = vsub.f32 %v4524_v2, %v5998_v6  ;;  %v3659_v47 = vpack.c.bf16 %v4259_v38, %v4246_v28  ;;  %v3661_v35 = vpack.c.bf16 %v4269_v43, %v4263_v40  ;;  %v4575_v6 = vand.u32 4294901760, %v20_v1 }
  0x36   :  { %3656 = vmatpush3.bf16.msra.mxu0 %v3655_v23  ;;  %v3649_v36 = vpack.c.bf16 %v478_v55, %v471_v44  ;;  %v359_v10 = vand.u32 4294901760, %v358_v24  ;;  %v4573_v13 = vsub.f32 %v21_v9, %v4563_v3  ;;  %v3663_v23 = vpack.c.bf16 %v4298_v58, %v4274_v46 }
  0x37   :  { %3658 = vmatprep.subr.bf16.mxu0 %v3657_v59  ;;  %v366_v8 = vand.u32 4294901760, %v365_v52  ;;  %v3665_v55 = vpack.c.bf16 %v4323_v12, %v4302_v63  ;;  %v6131_v24 = vand.u32 4294901760, %v4249_v31  ;;  %v6132_v59 = vand.u32 4294901760, %v4251_v32 }
  0x38   :  { %3650 = vmatprep.subr.bf16.mxu1 %v3649_v36  ;;  %v242_v52 = vand.u32 4294901760, %v4573_v13  ;;  %v4587_v9 = vsub.f32 %v20_v1, %v4575_v6  ;;  %v6133_v36 = vand.u32 4294901760, %v4219_v15  ;;  %v6135_v19 = vand.u32 4294901760, %v4240_v25 }
  0x39   :  { %v3651_v33 = vpack.c.bf16 %v366_v8, %v359_v10  ;;  %v3717_v44 = vpack.c.bf16 %v6132_v59, %v6131_v24  ;;  %v6134_v10 = vand.u32 4294901760, %v4229_v21  ;;  %v6136_v11 = vand.u32 4294901760, %v4242_v26 }
  0x3a   :  { %3660 = vmatpush3.bf16.msra.mxu0 %v3659_v47  ;;  %v6137_v31 = vand.u32 4294901760, %v4246_v28  ;;  %v6138_v32 = vand.u32 4294901760, %v4259_v38  ;;  %v6139_v1 = vand.u32 4294901760, %v4263_v40  ;;  %v6140_v15 = vand.u32 4294901760, %v4269_v43 }
  0x3b   :  { %v3719_v8 = vpack.c.bf16 %v6134_v10, %v6133_v36  ;;  %v4597_v48 = vpack.c.bf16 %v6136_v11, %v6135_v19  ;;  %3652 = vmatpush3.bf16.msra.mxu1 %v3651_v33  ;;  %3662 = vmatprep.subr.bf16.mxu0 %v3661_v35  ;;  %v6141_v25 = vand.u32 4294901760, %v4274_v46  ;;  %v6142_v26 = vand.u32 4294901760, %v4298_v58 }
  0x3c   :  { %v4603_v47 = vpack.c.bf16 %v6138_v32, %v6137_v31  ;;  %v4609_v21 = vpack.c.bf16 %v6140_v15, %v6139_v1  ;;  %3686 = vmatprep.subr.bf16.mxu1 %v4217_v14  ;;  %v243_v28 = vsub.f32 %v4573_v13, %v242_v52  ;;  %v248_v38 = vand.u32 4294901760, %v4587_v9 }
  0x3d   :  { %v4615_v11 = vpack.c.bf16 %v6142_v26, %v6141_v25  ;;  %v6143_v40 = vand.u32 4294901760, %v4302_v63  ;;  %v6144_v43 = vand.u32 4294901760, %v4323_v12  ;;  %v6145_v46 = vand.u32 4294901760, %v4327_v17  ;;  %v6153_v25 = vld [vmem:[#allocation3_spill] sm:$0xff]  ;;  %v74_v26 = vld [vmem:[%s5952_s1 + $0x180] sm:$0xff] }
  0x3e   :  { %v6146_v58 = vand.u32 4294901760, %v4341_v42  ;;  %v6147_v35 = vand.u32 4294901760, %v4345_v50  ;;  %v6148_v24 = vand.u32 4294901760, %v4360_v60  ;;  %v6149_v36 = vand.u32 4294901760, %v4369_v5  ;;  %483 = vmatmul.mubr.f32.vlgmr.msra.gmra.mrb[0].mxu1 %v4507_v57  ;;  %3664 = vmatpush3.bf16.msra.mxu0 %v3663_v23 }
  0x3f   :  { %v4626_v33 = vpack.c.bf16 %v6144_v43, %v6143_v40  ;;  %v6150_v63 = vand.u32 4294901760, %v4383_v30  ;;  %v3667_v12 = vpack.c.bf16 %v4341_v42, %v4327_v17  ;;  %v244_v31 = vand.u32 4294901760, %v243_v28  ;;  %3688 = vmatpush3.bf16.msra.mxu1 %v4227_v20  ;;  %3666 = vmatprep.subr.bf16.mxu0 %v3665_v55  ;;  %v6152_v55 = vld [vmem:[#allocation2_spill] sm:$0xff]  ;;  %v75_v28 = vld [vmem:[%s5952_s1 + $0x188] sm:$0xff]  ;;  %v6154_v40 = vld [vmem:[#allocation4_spill] sm:$0xff] }
  0x40   :  { %v4632_v19 = vpack.c.bf16 %v6146_v58, %v6145_v46  ;;  %v4638_v59 = vpack.c.bf16 %v6148_v24, %v6147_v35  ;;  %v249_v32 = vsub.f32 %v4587_v9, %v248_v38  ;;  %v3669_v1 = vpack.c.bf16 %v4360_v60, %v4345_v50  ;;  %3690 = vmatprep.subr.bf16.mxu1 %v4231_v22  ;;  %v6155_v43 = vld [vmem:[#allocation9_spill] sm:$0xff]  ;;  %v58_v46 = vld [vmem:[%s5952_s1 + $0x100] sm:$0xff] }
  0x41   :  { %v4644_v10 = vpack.c.bf16 %v6150_v63, %v6149_v36  ;;  %245 = vmatprep.mubr.f32.mxu0 %v244_v31  ;;  %488 = vmatprep.mubr.f32.mxu1 %v4563_v3  ;;  %v3671_v17 = vpack.c.bf16 %v4383_v30, %v4369_v5  ;;  %v3673_v42 = vpack.c.bf16 %v4402_v56, %v4387_v51  ;;  %v6151_v50 = vand.u32 4294901760, %v4510_v18  ;;  %v6156_v24 = vld [vmem:[#allocation5_spill] sm:$0xff]  ;;  %v6157_v36 = vld [vmem:[#allocation6_spill] sm:$0xff]  ;;  %v6158_v31 = vld [vmem:[#allocation8_spill] sm:$0xff] }
  0x42   :  { %v250_v15 = vand.u32 4294901760, %v249_v32  ;;  %3668 = vmatpush3.bf16.msra.mxu0 %v3667_v12  ;;  %490 = vmatmul.mubr.f32.gmra.mrb[2].mxu1 %v4575_v6  ;;  %v3675_v60 = vpack.c.bf16 %v4425_v61, %v4411_v0  ;;  %v3677_v5 = vpack.c.bf16 %v4444_v29, %v4429_v7  ;;  %v3679_v30 = vpack.c.bf16 %v4467_v53, %v4453_v54 }
  0x43   :  { %3692 = vmatpush3.bf16.msra.mxu1 %v4244_v27  ;;  %3670 = vmatprep.subr.bf16.mxu0 %v3669_v1  ;;  %v3683_v23 = vpack.c.bf16 %v4524_v2, %v4492_v41  ;;  %v1096_v58 = vand.u32 4294901760, %v74_v26  ;;  %v1099_v35 = vand.u32 4294901760, %v75_v28  ;;  %v1048_v63 = vand.u32 4294901760, %v58_v46  ;;  %v76_v1 = vld [vmem:[%s5952_s1 + $0x190] sm:$0xff] }
  0x44   :  { %3694 = vmatprep.subr.bf16.mxu1 %v4261_v39  ;;  %251 = vmatmul.mubr.f32.gmra.mrb[2].mxu0 %v250_v15  ;;  %v6159_v15 = vld [vmem:[#allocation7_spill] sm:$0xff] }
  0x45   :  { %625 = vmatprep.mubr.f32.mxu0 %v4510_v18  ;;  %741 = vmatprep.mubr.f32.mxu1 %v6151_v50  ;;  %v3681_v18 = vpack.c.bf16 %v4483_v34, %v4471_v37  ;;  %v4705_v32 = vsub.f32 %v74_v26, %v1096_v58  ;;  %v61_v50 = vld [vmem:[%s5952_s1 + $0x118] sm:$0xff]  ;;  %v6164_v26 = vand.u32 4294901760, %v4425_v61  ;;  %v6167_v61 = vand.u32 4294901760, %v4453_v54 }
  0x46   :  { %3672 = vmatpush3.bf16.msra.mxu0 %v3671_v17  ;;  %v6172_v54 = vand.u32 4294901760, %v4524_v2 }
  0x47   :  { %3696 = vmatpush3.bf16.msra.mxu1 %v4272_v45  ;;  %3674 = vmatprep.subr.bf16.mxu0 %v3673_v42  ;;  %v60_v42 = vld [vmem:[%s5952_s1 + $0x110] sm:$0xff] }
  0x48   :  { %3698 = vmatprep.subr.bf16.mxu1 %v4300_v62 }
  0x4a   :  { %3676 = vmatpush3.bf16.msra.mxu0 %v3675_v60  ;;  %v6160_v60 = vand.u32 4294901760, %v4387_v51  ;;  %v6166_v51 = vand.u32 4294901760, %v4444_v29  ;;  %v6169_v29 = vand.u32 4294901760, %v4471_v37  ;;  %v4778_v37 = vpack.c.bf16 %v1099_v35, %v1096_v58 }
  0x4b   :  { %3700 = vmatpush3.bf16.msra.mxu1 %v4325_v16  ;;  %3678 = vmatprep.subr.bf16.mxu0 %v3677_v5  ;;  %v6161_v5 = vand.u32 4294901760, %v4402_v56  ;;  %v78_v56 = vld [vmem:[%s5952_s1 + $0x1a0] sm:$0xff] }
  0x4c   :  { %3702 = vmatprep.subr.bf16.mxu1 %v4343_v49 }
  0x4e   :  { %3680 = vmatpush3.bf16.msra.mxu0 %v3679_v30  ;;  %v3737_v30 = vpack.c.bf16 %v6161_v5, %v6160_v60  ;;  %v6170_v60 = vand.u32 4294901760, %v4483_v34 }
  0x4f   :  { %3704 = vmatpush3.bf16.msra.mxu1 %v4367_v4  ;;  %3682 = vmatprep.subr.bf16.mxu0 %v3681_v18 }
  0x50   :  { %3706 = vmatprep.subr.bf16.mxu1 %v6152_v55  ;;  %v4765_v5 = vpack.c.bf16 %v6170_v60, %v6169_v29 }
  0x52   :  { %3684 = vmatpush3.bf16.msra.mxu0 %v3683_v23  ;;  %v6163_v23 = vand.u32 4294901760, %v4411_v0  ;;  %v6168_v0 = vand.u32 4294901760, %v4467_v53  ;;  %v6171_v53 = vand.u32 4294901760, %v4492_v41  ;;  %v63_v41 = vld [vmem:[%s5952_s1 + $0x128] sm:$0xff] }
  0x53   :  { %3708 = vmatpush3.bf16.msra.mxu1 %v6153_v25  ;;  %3718 = vmatprep.subr.bf16.mxu0 %v3717_v44  ;;  %v59_v44 = vld [vmem:[%s5952_s1 + $0x108] sm:$0xff] }
  0x54   :  { %3710 = vmatprep.subr.bf16.mxu1 %v6154_v40  ;;  %v1051_v12 = vand.u32 4294901760, %v59_v44 }
  0x55   :  { %628 = vmatmul.mubr.f32.vlgmr.msra.gmra.mrb[4].mxu0 %v6155_v43 }
  0x56   :  { %3720 = vmatpush3.bf16.msra.mxu0 %v3719_v8  ;;  %634 = vmatprep.mubr.f32.mxu0 %v4573_v13  ;;  %v4707_v8 = vsub.f32 %v75_v28, %v1099_v35  ;;  %v4720_v17 = vsub.f32 %v59_v44, %v1051_v12  ;;  %v4739_v28 = vpack.c.bf16 %v6164_v26, %v6163_v23  ;;  %v1057_v23 = vand.u32 4294901760, %v61_v50 }
  0x57   :  { %3712 = vmatpush3.bf16.msra.mxu1 %v6156_v24  ;;  %3722 = vmatprep.subr.bf16.mxu0 %v4597_v48  ;;  %v77_v48 = vld [vmem:[%s5952_s1 + $0x198] sm:$0xff]  ;;  %v4776_v13 = vpack.c.bf16 %v6172_v54, %v6171_v53  ;;  %v4782_v26 = vpack.c.bf16 %v1051_v12, %v1048_v63  ;;  %v80_v12 = vld [vmem:[%s5952_s1 + $0x1b0] sm:$0xff] }
  0x58   :  { %3714 = vmatprep.subr.bf16.mxu1 %v6157_v36  ;;  %v1105_v18 = vand.u32 4294901760, %v77_v48 }
  0x59   :  { %637 = vmatmul.mubr.f32.gmra.mrb[6].mxu0 %v4587_v9  ;;  %6173 = vst [vmem:[#allocation2_spill] sm:$0xff] %v4782_v26 }
  0x5a   :  { %3724 = vmatpush3.bf16.msra.mxu0 %v4603_v47  ;;  %922 = vmatprep.mubr.f32.mxu0 %v6158_v31  ;;  %v4718_v47 = vsub.f32 %v58_v46, %v1048_v63  ;;  %v6165_v46 = vand.u32 4294901760, %v4429_v7  ;;  %v4759_v7 = vpack.c.bf16 %v6168_v0, %v6167_v61 }
  0x5b   :  { %3716 = vmatpush3.bf16.msra.mxu1 %v6159_v15  ;;  %3726 = vmatprep.subr.bf16.mxu0 %v4609_v21  ;;  %v1102_v21 = vand.u32 4294901760, %v76_v1 }
  0x5c   :  { %3750 = vmatprep.subr.bf16.mxu1 %v4217_v14  ;;  %v6162_v14 = vand.u32 4294901760, %v6155_v43  ;;  %v4745_v44 = vpack.c.bf16 %v6166_v51, %v6165_v46  ;;  %v6017_v43 = vand.u32 4294901760, %v4705_v32  ;;  %v6011_v34 = vand.u32 4294901760, %v4718_v47 }
  0x5d   :  { %v4784_v46 = vsub.f32 %v76_v1, %v1102_v21  ;;  %v4786_v51 = vsub.f32 %v77_v48, %v1105_v18  ;;  %v4797_v2 = vpack.c.bf16 %v1105_v18, %v1102_v21  ;;  %v17_v1 = vld [vmem:[%s5953_s0 + $0x18] sm:$0xff]  ;;  %v1063_v21 = vand.u32 4294901760, %v63_v41 }
  0x5e   :  { %745 = vmatmul.mubr.f32.vlgmr.msra.gmra.mrb[4].mxu1 %v6162_v14  ;;  %3728 = vmatpush3.bf16.msra.mxu0 %v4615_v11  ;;  %v6012_v11 = vand.u32 4294901760, %v4707_v8  ;;  %v1054_v14 = vand.u32 4294901760, %v60_v42  ;;  %v1290_v35 = vsub.f32 %v4705_v32, %v6017_v43  ;;  %v1114_v18 = vand.u32 4294901760, %v80_v12 }
  0x5f   :  { %3752 = vmatpush3.bf16.msra.mxu1 %v4227_v20  ;;  %752 = vmatprep.mubr.f32.mxu1 %v242_v52  ;;  %v79_v20 = vld [vmem:[%s5952_s1 + $0x1a8] sm:$0xff]  ;;  %v6006_v52 = vand.u32 4294901760, %v4720_v17  ;;  %6174 = vst [vmem:[#allocation3_spill] sm:$0xff] %v4797_v2  ;;  %v4837_v60 = vand.u32 4294901760, %v17_v1 }
  0x60   :  { %3730 = vmatprep.subr.bf16.mxu0 %v4626_v33  ;;  %3754 = vmatprep.subr.bf16.mxu1 %v4231_v22  ;;  %v1108_v33 = vand.u32 4294901760, %v78_v56  ;;  %v62_v22 = vld [vmem:[%s5952_s1 + $0x120] sm:$0xff]  ;;  %v1111_v58 = vand.u32 4294901760, %v79_v20  ;;  %v1297_v63 = vsub.f32 %v4707_v8, %v6012_v11  ;;  %v4810_v9 = vpack.c.bf16 %v1057_v23, %v1054_v14 }
  0x61   :  { %v1060_v48 = vand.u32 4294901760, %v62_v22  ;;  %v1291_v0 = vand.u32 4294901760, %v1290_v35  ;;  %6175 = vst [vmem:[#allocation4_spill] sm:$0xff] %v4837_v60  ;;  %v4857_v35 = vsub.f32 %v80_v12, %v1114_v18  ;;  %v4872_v12 = vsub.f32 %v17_v1, %v4837_v60 }
  0x62   :  { %756 = vmatmul.mubr.f32.gmra.mrb[6].mxu1 %v248_v38  ;;  %3732 = vmatpush3.bf16.msra.mxu0 %v4632_v19  ;;  %v4812_v38 = vsub.f32 %v60_v42, %v1054_v14  ;;  %v4814_v19 = vsub.f32 %v61_v50, %v1057_v23  ;;  %v81_v42 = vld [vmem:[%s5952_s1 + $0x1b8] sm:$0xff]  ;;  %v4830_v50 = vsub.f32 %v78_v56, %v1108_v33  ;;  %v1298_v29 = vand.u32 4294901760, %v1297_v63  ;;  %v64_v23 = vld [vmem:[%s5952_s1 + $0x130] sm:$0xff] }
  0x63   :  { %3756 = vmatpush3.bf16.msra.mxu1 %v4244_v27  ;;  %3734 = vmatprep.subr.bf16.mxu0 %v4638_v59  ;;  %v1178_v27 = vsub.f32 %v4718_v47, %v6011_v34  ;;  %v1185_v59 = vsub.f32 %v4720_v17, %v6006_v52  ;;  %v4835_v61 = vpack.c.bf16 %v1111_v58, %v1108_v33  ;;  %v1117_v56 = vand.u32 4294901760, %v81_v42 }
  0x64   :  { %3758 = vmatprep.subr.bf16.mxu1 %v4261_v39  ;;  %1033 = vmatprep.mubr.f32.mxu1 %v6158_v31  ;;  %v6010_v39 = vand.u32 4294901760, %v4784_v46  ;;  %v6009_v31 = vand.u32 4294901760, %v4786_v51  ;;  %v4840_v14 = vsub.f32 %v79_v20, %v1111_v58  ;;  %v6007_v53 = vand.u32 4294901760, %v4812_v38  ;;  %6177 = vst [vmem:[#allocation5_spill] sm:$0xff] %v4857_v35 }
  0x65   :  { %v6008_v54 = vand.u32 4294901760, %v4814_v19  ;;  %v4851_v33 = vpack.c.bf16 %v1063_v21, %v1060_v48  ;;  %v1186_v20 = vand.u32 4294901760, %v1185_v59  ;;  %v4855_v58 = vsub.f32 %v63_v41, %v1063_v21  ;;  %v82_v41 = vld [vmem:[%s5952_s1 + $0x1c0] sm:$0xff]  ;;  %v83_v59 = vld [vmem:[%s5952_s1 + $0x1c8] sm:$0xff] }
  0x66   :  { %3736 = vmatpush3.bf16.msra.mxu0 %v4644_v10  ;;  %v65_v10 = vld [vmem:[%s5952_s1 + $0x138] sm:$0xff]  ;;  %v1304_v63 = vsub.f32 %v4784_v46, %v6010_v39  ;;  %v1311_v52 = vsub.f32 %v4786_v51, %v6009_v31  ;;  %v4876_v21 = vpack.c.bf16 %v1117_v56, %v1114_v18  ;;  %v6015_v18 = vand.u32 4294901760, %v4840_v14 }
  0x67   :  { %3760 = vmatpush3.bf16.msra.mxu1 %v4272_v45  ;;  %3738 = vmatprep.subr.bf16.mxu0 %v3737_v30  ;;  %6176 = vst [vmem:[#allocation9_spill] sm:$0xff] %v4851_v33  ;;  %v4853_v45 = vsub.f32 %v62_v22, %v1060_v48  ;;  %v1179_v30 = vand.u32 4294901760, %v1178_v27  ;;  %v1066_v22 = vand.u32 4294901760, %v64_v23  ;;  %v1069_v48 = vand.u32 4294901760, %v65_v10 }
  0x68   :  { %3762 = vmatprep.subr.bf16.mxu1 %v4300_v62  ;;  %v4866_v62 = vpack.c.bf16 %v1298_v29, %v1291_v0  ;;  %6178 = vst [vmem:[#allocation6_spill] sm:$0xff] %v4876_v21  ;;  %v1199_v27 = vsub.f32 %v4814_v19, %v6008_v54  ;;  %v1305_v0 = vand.u32 4294901760, %v1304_v63  ;;  %v1312_v29 = vand.u32 4294901760, %v1311_v52  ;;  %v4897_v54 = vld [vmem:[%s5952_s1 + $0x140] sm:$0xff] }
  0x69   :  { %v4888_v1 = vpack.c.bf16 %v1186_v20, %v1179_v30  ;;  %v1123_v30 = vand.u32 4294901760, %v83_v59  ;;  %v6014_v52 = vand.u32 4294901760, %v4855_v58  ;;  %v6018_v20 = vand.u32 4294901760, %v4872_v12 }
  0x6a   :  { %3740 = vmatpush3.bf16.msra.mxu0 %v4739_v28  ;;  %v1192_v28 = vsub.f32 %v4812_v38, %v6007_v53  ;;  %v1120_v53 = vand.u32 4294901760, %v82_v41  ;;  %v4912_v63 = vsub.f32 %v64_v23, %v1066_v22  ;;  %v4914_v31 = vsub.f32 %v65_v10, %v1069_v48 }
  0x6b   :  { %3764 = vmatpush3.bf16.msra.mxu1 %v4325_v16  ;;  %3742 = vmatprep.subr.bf16.mxu0 %v4745_v44  ;;  %v4890_v16 = vsub.f32 %v81_v42, %v1117_v56  ;;  %v6016_v44 = vand.u32 4294901760, %v4830_v50  ;;  %v6013_v42 = vand.u32 4294901760, %v4853_v45  ;;  %v4906_v56 = vpack.c.bf16 %v1069_v48, %v1066_v22 }
  0x6c   :  { %3766 = vmatprep.subr.bf16.mxu1 %v4343_v49  ;;  %v4902_v49 = vld [vmem:[%s5952_s1 + $0x148] sm:$0xff]  ;;  %6181 = vst [vmem:[#allocation10_spill] sm:$0xff] %v4912_v63  ;;  %6182 = vst [vmem:[#allocation11_spill] sm:$0xff] %v4914_v31  ;;  %v1193_v39 = vand.u32 4294901760, %v1192_v28  ;;  %v1200_v34 = vand.u32 4294901760, %v1199_v27  ;;  %v1325_v11 = vsub.f32 %v4840_v14, %v6015_v18  ;;  %v4925_v23 = vpack.c.bf16 %v1312_v29, %v1305_v0  ;;  %v85_v29 = vld [vmem:[%s5952_s1 + $0x1d8] sm:$0xff] }
  0x6d   :  { %6179 = vst [vmem:[#allocation8_spill] sm:$0xff] %v4890_v16  ;;  %6180 = vst [vmem:[#allocation7_spill] sm:$0xff] %v4906_v56  ;;  %v1206_v10 = vsub.f32 %v4853_v45, %v6013_v42  ;;  %v6019_v22 = vand.u32 4294901760, %v4857_v35  ;;  %v6022_v48 = vand.u32 4294901760, %v4890_v16  ;;  %v4936_v28 = vpack.c.bf16 %v1123_v30, %v1120_v53 }
  0x6e   :  { %3744 = vmatpush3.bf16.msra.mxu0 %v4759_v7  ;;  %v1318_v7 = vsub.f32 %v4830_v50, %v6016_v44  ;;  %v4938_v27 = vsub.f32 %v82_v41, %v1120_v53  ;;  %v1213_v0 = vsub.f32 %v4855_v58, %v6014_v52  ;;  %v1146_v42 = vsub.f32 %v4872_v12, %v6018_v20  ;;  %v68_v41 = vld [vmem:[%s5952_s1 + $0x150] sm:$0xff]  ;;  %v69_v52 = vld [vmem:[%s5952_s1 + $0x158] sm:$0xff] }
  0x6f   :  { %3768 = vmatpush3.bf16.msra.mxu1 %v4367_v4  ;;  %3746 = vmatprep.subr.bf16.mxu0 %v4765_v5  ;;  %v1072_v4 = vand.u32 4294901760, %v4897_v54  ;;  %v1075_v5 = vand.u32 4294901760, %v4902_v49  ;;  %6183 = vst [vmem:[#allocation12_spill] sm:$0xff] %v4936_v28  ;;  %v4953_v53 = vsub.f32 %v83_v59, %v1123_v30  ;;  %v1326_v43 = vand.u32 4294901760, %v1325_v11 }
  0x70   :  { %3770 = vmatprep.subr.bf16.mxu1 %v6152_v55  ;;  %v84_v55 = vld [vmem:[%s5952_s1 + $0x1d0] sm:$0xff]  ;;  %v1207_v59 = vand.u32 4294901760, %v1206_v10  ;;  %v1129_v30 = vand.u32 4294901760, %v85_v29  ;;  %v1332_v20 = vsub.f32 %v4857_v35, %v6019_v22  ;;  %v1339_v18 = vsub.f32 %v4890_v16, %v6022_v48 }
  0x71   :  { %v1078_v11 = vand.u32 4294901760, %v68_v41  ;;  %v1147_v44 = vand.u32 4294901760, %v1146_v42  ;;  %v6185_v10 = vand.u32 4294901760, %v4912_v63  ;;  %v6186_v35 = vand.u32 4294901760, %v4914_v31  ;;  %v87_v42 = vld [vmem:[%s5952_s1 + $0x1e8] sm:$0xff] }
  0x72   :  { %3748 = vmatpush3.bf16.msra.mxu0 %v4776_v13  ;;  %v4951_v13 = vpack.c.bf16 %v1200_v34, %v1193_v39  ;;  %v4964_v34 = vpack.c.bf16 %v1075_v5, %v1072_v4  ;;  %v1126_v39 = vand.u32 4294901760, %v84_v55  ;;  %v5005_v16 = vsub.f32 %v85_v29, %v1129_v30 }
  0x73   :  { %3772 = vmatpush3.bf16.msra.mxu1 %v6153_v25  ;;  %3782 = vmatprep.subr.bf16.mxu0 %v4778_v37  ;;  %v1319_v25 = vand.u32 4294901760, %v1318_v7  ;;  %v1081_v7 = vand.u32 4294901760, %v69_v52  ;;  %v1220_v22 = vsub.f32 %v4912_v63, %v6185_v10  ;;  %v1227_v48 = vsub.f32 %v4914_v31, %v6186_v35 }
  0x74   :  { %3774 = vmatprep.subr.bf16.mxu1 %v6154_v40  ;;  %6184 = vst [vmem:[#allocation13_spill] sm:$0xff] %v4964_v34  ;;  %v1214_v40 = vand.u32 4294901760, %v1213_v0  ;;  %v4995_v10 = vsub.f32 %v4897_v54, %v1072_v4  ;;  %v4998_v35 = vsub.f32 %v4902_v49, %v1075_v5  ;;  %v5000_v31 = vsub.f32 %v84_v55, %v1126_v39 }
  0x75   :  { %924 = vmatmul.mubr.f32.vlgmr.msra.gmra.mrb[8].mxu0 %v4507_v57  ;;  %v5003_v63 = vpack.c.bf16 %v1129_v30, %v1126_v39  ;;  %v1340_v0 = vand.u32 4294901760, %v1339_v18  ;;  %v5016_v49 = vpack.c.bf16 %v1081_v7, %v1078_v11  ;;  %v1135_v5 = vand.u32 4294901760, %v87_v42 }
  0x76   :  { %3784 = vmatpush3.bf16.msra.mxu0 %v4782_v26  ;;  %929 = vmatprep.mubr.f32.mxu0 %v4563_v3  ;;  %v86_v26 = vld [vmem:[%s5952_s1 + $0x1e0] sm:$0xff]  ;;  %v5014_v54 = vpack.c.bf16 %v1214_v40, %v1207_v59  ;;  %v1221_v18 = vand.u32 4294901760, %v1220_v22  ;;  %v6188_v55 = vand.u32 4294901760, %v4938_v27  ;;  %v5027_v59 = vsub.f32 %v68_v41, %v1078_v11  ;;  %v5033_v22 = vld [vmem:[%s5952_s1 + $0x1f0] sm:$0xff] }
  0x77   :  { %3776 = vmatpush3.bf16.msra.mxu1 %v6156_v24  ;;  %3786 = vmatprep.subr.bf16.mxu0 %v4797_v2  ;;  %v4992_v2 = vpack.c.bf16 %v1326_v43, %v1319_v25  ;;  %6187 = vst [vmem:[#allocation14_spill] sm:$0xff] %v5003_v63  ;;  %v1333_v24 = vand.u32 4294901760, %v1332_v20  ;;  %v71_v43 = vld [vmem:[%s5952_s1 + $0x168] sm:$0xff]  ;;  %v1132_v4 = vand.u32 4294901760, %v86_v26  ;;  %v1228_v20 = vand.u32 4294901760, %v1227_v48 }
  0x78   :  { %3778 = vmatprep.subr.bf16.mxu1 %v6157_v36  ;;  %v70_v36 = vld [vmem:[%s5952_s1 + $0x160] sm:$0xff]  ;;  %v1346_v29 = vsub.f32 %v4938_v27, %v6188_v55  ;;  %v6189_v25 = vand.u32 4294901760, %v4953_v53  ;;  %v5037_v40 = vsub.f32 %v69_v52, %v1081_v7  ;;  %v6036_v52 = vand.u32 4294901760, %v5005_v16  ;;  %v16_v7 = vld [vmem:[%s5953_s0 + $0x10] sm:$0xff] }
  0x79   :  { %931 = vmatmul.mubr.f32.gmra.mrb[10].mxu0 %v4575_v6  ;;  %v1084_v30 = vand.u32 4294901760, %v70_v36  ;;  %v5035_v48 = vpack.c.bf16 %v1340_v0, %v1333_v24  ;;  %v5048_v11 = vpack.c.bf16 %v1135_v5, %v1132_v4  ;;  %v5052_v24 = vsub.f32 %v87_v42, %v1135_v5  ;;  %v5079_v5 = vld [vmem:[%s5952_s1 + $0x170] sm:$0xff] }
  0x7a   :  { %3788 = vmatpush3.bf16.msra.mxu0 %v4810_v9  ;;  %1148 = vmatprep.mubr.f32.mxu0 %v1147_v44  ;;  %v1353_v39 = vsub.f32 %v4953_v53, %v6189_v25  ;;  %v1087_v44 = vand.u32 4294901760, %v71_v43  ;;  %6190 = vst [vmem:[#allocation15_spill] sm:$0xff] %v5037_v40  ;;  %v5050_v25 = vsub.f32 %v86_v26, %v1132_v4  ;;  %v1138_v55 = vand.u32 4294901760, %v5033_v22  ;;  %v23_v26 = vld [vmem:[%s5953_s0 + $0x48] sm:$0xff] }
  0x7b   :  { %3780 = vmatpush3.bf16.msra.mxu1 %v6159_v15  ;;  %3790 = vmatprep.subr.bf16.mxu0 %v4835_v61  ;;  %v6033_v15 = vand.u32 4294901760, %v4995_v10  ;;  %v5060_v0 = vpack.c.bf16 %v1228_v20, %v1221_v18  ;;  %v5070_v4 = vsub.f32 %v70_v36, %v1084_v30  ;;  %v5084_v18 = vld [vmem:[%s5952_s1 + $0x178] sm:$0xff]  ;;  %v6192_v36 = vand.u32 4294901760, %v4998_v35 }
  0x7c   :  { %3814 = vmatprep.subr.bf16.mxu1 %v4866_v62  ;;  %v5043_v62 = vld [vmem:[%s5952_s1 + $0x1f8] sm:$0xff]  ;;  %6191 = vst [vmem:[#allocation16_spill] sm:$0xff] %v5050_v25  ;;  %v1354_v41 = vand.u32 4294901760, %v1353_v39  ;;  %v5068_v42 = vpack.c.bf16 %v1087_v44, %v1084_v30  ;;  %v5094_v30 = vand.u32 4294901760, %v16_v7 }
  0x7d   :  { %v1241_v20 = vsub.f32 %v4998_v35, %v6192_v36  ;;  %v22_v36 = vld [vmem:[%s5953_s0 + $0x40] sm:$0xff] }
  0x7e   :  { %1035 = vmatmul.mubr.f32.vlgmr.msra.gmra.mrb[8].mxu1 %v4507_v57  ;;  %3792 = vmatpush3.bf16.msra.mxu0 %v4851_v33  ;;  %v1347_v57 = vand.u32 4294901760, %v1346_v29  ;;  %v6193_v29 = vand.u32 4294901760, %v5000_v31  ;;  %v6196_v33 = vand.u32 4294901760, %v5037_v40 }
  0x7f   :  { %3816 = vmatpush3.bf16.msra.mxu1 %v4888_v1  ;;  %1040 = vmatprep.mubr.f32.mxu1 %v4563_v3  ;;  %v1234_v3 = vsub.f32 %v4995_v10, %v6033_v15  ;;  %v1141_v1 = vand.u32 4294901760, %v5043_v62  ;;  %v1367_v15 = vsub.f32 %v5005_v16, %v6036_v52  ;;  %v1090_v52 = vand.u32 4294901760, %v5079_v5 }
  0x80   :  { %3794 = vmatprep.subr.bf16.mxu0 %v4876_v21  ;;  %3818 = vmatprep.subr.bf16.mxu1 %v4925_v23  ;;  %v5086_v23 = vsub.f32 %v71_v43, %v1087_v44  ;;  %v1360_v39 = vsub.f32 %v5000_v31, %v6193_v29  ;;  %v5103_v21 = vand.u32 4294901760, %v23_v26  ;;  %v5111_v29 = vsub.f32 %v5033_v22, %v1138_v55 }
  0x81   :  { %v1093_v43 = vand.u32 4294901760, %v5084_v18  ;;  %v1235_v44 = vand.u32 4294901760, %v1234_v3  ;;  %v5123_v22 = vsub.f32 %v16_v7, %v5094_v30  ;;  %v6195_v3 = vand.u32 4294901760, %v5027_v59 }
  0x82   :  { %1042 = vmatmul.mubr.f32.gmra.mrb[10].mxu1 %v4575_v6  ;;  %3796 = vmatpush3.bf16.msra.mxu0 %v4906_v56  ;;  %v3829_v6 = vpack.c.bf16 %v1354_v41, %v1347_v57  ;;  %v5117_v56 = vsub.f32 %v5043_v62, %v1141_v1  ;;  %v1242_v41 = vand.u32 4294901760, %v1241_v20  ;;  %v1361_v57 = vand.u32 4294901760, %v1360_v39 }
  0x83   :  { %3820 = vmatpush3.bf16.msra.mxu1 %v4951_v13  ;;  %3798 = vmatprep.subr.bf16.mxu0 %v4936_v28  ;;  %v5125_v28 = vand.u32 4294901760, %v22_v36  ;;  %v1248_v62 = vsub.f32 %v5027_v59, %v6195_v3  ;;  %v1255_v13 = vsub.f32 %v5037_v40, %v6196_v33  ;;  %v5140_v7 = vsub.f32 %v5079_v5, %v1090_v52 }
  0x84   :  { %3822 = vmatprep.subr.bf16.mxu1 %v4992_v2  ;;  %1399 = vmatprep.mubr.f32.mxu1 %v4837_v60  ;;  %v1368_v2 = vand.u32 4294901760, %v1367_v15  ;;  %v5135_v60 = vsub.f32 %v23_v26, %v5103_v21  ;;  %v5143_v15 = vsub.f32 %v5084_v18, %v1093_v43  ;;  %v6197_v33 = vand.u32 4294901760, %v5050_v25 }
  0x85   :  { %6194 = vst [vmem:[#allocation17_spill] sm:$0xff] %v5125_v28  ;;  %v6054_v5 = vand.u32 4294901760, %v5111_v29  ;;  %v3831_v18 = vpack.c.bf16 %v1242_v41, %v1235_v44  ;;  %v6055_v20 = vand.u32 4294901760, %v5123_v22  ;;  %v5160_v39 = vsub.f32 %v22_v36, %v5125_v28 }
  0x86   :  { %3800 = vmatpush3.bf16.msra.mxu0 %v4964_v34  ;;  %v1374_v26 = vsub.f32 %v5050_v25, %v6197_v33  ;;  %v5156_v34 = vpack.c.bf16 %v1141_v1, %v1138_v55  ;;  %v1249_v33 = vand.u32 4294901760, %v1248_v62  ;;  %v1256_v25 = vand.u32 4294901760, %v1255_v13 }
  0x87   :  { %3824 = vmatpush3.bf16.msra.mxu1 %v5014_v54  ;;  %3802 = vmatprep.subr.bf16.mxu0 %v5003_v63  ;;  %v6198_v54 = vand.u32 4294901760, %v5052_v24  ;;  %v6053_v63 = vand.u32 4294901760, %v5117_v56  ;;  %v6056_v40 = vand.u32 4294901760, %v5135_v60  ;;  %v6199_v44 = vand.u32 4294901760, %v5070_v4 }
  0x88   :  { %3826 = vmatprep.subr.bf16.mxu1 %v5035_v48  ;;  %v3833_v48 = vpack.c.bf16 %v1368_v2, %v1361_v57  ;;  %v6200_v1 = vand.u32 4294901760, %v5086_v23  ;;  %v6057_v41 = vand.u32 4294901760, %v5140_v7  ;;  %v6058_v57 = vand.u32 4294901760, %v5143_v15 }
  0x89   :  { %v1381_v3 = vsub.f32 %v5052_v24, %v6198_v54  ;;  %v1262_v55 = vsub.f32 %v5070_v4, %v6199_v44  ;;  %v1375_v13 = vand.u32 4294901760, %v1374_v26  ;;  %v1395_v62 = vsub.f32 %v5117_v56, %v6053_v63 }
  0x8a   :  { %3804 = vmatpush3.bf16.msra.mxu0 %v5016_v49  ;;  %v1269_v36 = vsub.f32 %v5086_v23, %v6200_v1  ;;  %v1152_v54 = vsub.f32 %v5123_v22, %v6055_v20  ;;  %v5185_v1 = vpack.c.bf16 %v1093_v43, %v1090_v52  ;;  %v3845_v26 = vpack.c.bf16 %v4707_v8, %v4705_v32 }
  0x8b   :  { %3828 = vmatpush3.bf16.msra.mxu1 %v5060_v0  ;;  %3806 = vmatprep.subr.bf16.mxu0 %v5048_v11  ;;  %v1382_v2 = vand.u32 4294901760, %v1381_v3  ;;  %v1388_v0 = vsub.f32 %v5111_v29, %v6054_v5  ;;  %v1161_v3 = vsub.f32 %v5135_v60, %v6056_v40  ;;  %v1263_v63 = vand.u32 4294901760, %v1262_v55 }
  0x8c   :  { %3830 = vmatprep.subr.bf16.mxu1 %v3829_v6  ;;  %6201 = vst [vmem:[#allocation18_spill] sm:$0xff] %v5185_v1  ;;  %v3835_v6 = vpack.c.bf16 %v1256_v25, %v1249_v33  ;;  %v1270_v5 = vand.u32 4294901760, %v1269_v36  ;;  %v1276_v20 = vsub.f32 %v5140_v7, %v6057_v41  ;;  %v1283_v25 = vsub.f32 %v5143_v15, %v6058_v57 }
  0x8d   :  { %v3837_v52 = vpack.c.bf16 %v1382_v2, %v1375_v13  ;;  %v1389_v43 = vand.u32 4294901760, %v1388_v0  ;;  %v1396_v33 = vand.u32 4294901760, %v1395_v62  ;;  %v1153_v44 = vand.u32 4294901760, %v1152_v54 }
  0x8e   :  { %3808 = vmatpush3.bf16.msra.mxu0 %v5068_v42  ;;  %v6202_v40 = vand.u32 4294901760, %v5160_v39  ;;  %v3847_v55 = vpack.c.bf16 %v4720_v17, %v4718_v47  ;;  %v1162_v36 = vand.u32 4294901760, %v1161_v3  ;;  %v3839_v41 = vpack.c.bf16 %v1270_v5, %v1263_v63  ;;  %v6203_v5 = vld [vmem:[#allocation5_spill] sm:$0xff] }
  0x8f   :  { %3832 = vmatpush3.bf16.msra.mxu1 %v3831_v18  ;;  %3810 = vmatprep.subr.bf16.mxu0 %v5156_v34  ;;  %v1277_v13 = vand.u32 4294901760, %v1276_v20  ;;  %v1284_v2 = vand.u32 4294901760, %v1283_v25  ;;  %v3841_v0 = vpack.c.bf16 %v1396_v33, %v1389_v43  ;;  %v3853_v63 = vpack.c.bf16 %v4840_v14, %v4830_v50  ;;  %v6207_v25 = vld [vmem:[#allocation2_spill] sm:$0xff]  ;;  %v6208_v43 = vld [vmem:[#allocation3_spill] sm:$0xff] }
  0x90   :  { %3834 = vmatprep.subr.bf16.mxu1 %v3833_v48  ;;  %v1167_v18 = vsub.f32 %v5160_v39, %v6202_v40  ;;  %v3849_v48 = vpack.c.bf16 %v4786_v51, %v4784_v46  ;;  %v3851_v40 = vpack.c.bf16 %v4814_v19, %v4812_v38  ;;  %v3855_v20 = vpack.c.bf16 %v4855_v58, %v4853_v45 }
  0x91   :  { %v3843_v54 = vpack.c.bf16 %v1284_v2, %v1277_v13  ;;  %v3863_v33 = vpack.c.bf16 %v4998_v35, %v4995_v10  ;;  %v6211_v13 = vld [vmem:[#allocation9_spill] sm:$0xff]  ;;  %v6212_v2 = vld [vmem:[#allocation16_spill] sm:$0xff] }
  0x92   :  { %3812 = vmatpush3.bf16.msra.mxu0 %v5185_v1  ;;  %v1168_v62 = vand.u32 4294901760, %v1167_v18  ;;  %v3865_v18 = vpack.c.bf16 %v5005_v16, %v5000_v31 }
  0x93   :  { %3836 = vmatpush3.bf16.msra.mxu1 %v3835_v6  ;;  %3846 = vmatprep.subr.bf16.mxu0 %v3845_v26  ;;  %v6205_v6 = vld [vmem:[#allocation10_spill] sm:$0xff]  ;;  %v6206_v26 = vld [vmem:[#allocation11_spill] sm:$0xff] }
  0x94   :  { %3838 = vmatprep.subr.bf16.mxu1 %v3837_v52  ;;  %v3859_v3 = vpack.c.bf16 %v6206_v26, %v6205_v6  ;;  %v3861_v52 = vpack.c.bf16 %v4953_v53, %v4938_v27 }
  0x95   :  { %1154 = vmatmul.mubr.f32.vlgmr.msra.gmra.mrb[12].mxu0 %v1153_v44  ;;  %v6204_v44 = vld [vmem:[#allocation8_spill] sm:$0xff] }
  0x96   :  { %3848 = vmatpush3.bf16.msra.mxu0 %v3847_v55  ;;  %1163 = vmatprep.mubr.f32.mxu0 %v1162_v36  ;;  %v6209_v55 = vand.u32 4294901760, %v4872_v12  ;;  %v6210_v36 = vld [vmem:[#allocation15_spill] sm:$0xff] }
  0x97   :  { %3840 = vmatpush3.bf16.msra.mxu1 %v3839_v41  ;;  %3850 = vmatprep.subr.bf16.mxu0 %v3849_v48  ;;  %v3857_v41 = vpack.c.bf16 %v6204_v44, %v6203_v5  ;;  %v3867_v48 = vpack.c.bf16 %v6210_v36, %v5027_v59 }
  0x98   :  { %3842 = vmatprep.subr.bf16.mxu1 %v3841_v0  ;;  %v3869_v0 = vpack.c.bf16 %v5052_v24, %v6212_v2 }
  0x99   :  { %1169 = vmatmul.mubr.f32.gmra.mrb[14].mxu0 %v1168_v62  ;;  %v6213_v62 = vld [vmem:[#allocation6_spill] sm:$0xff] }
  0x9a   :  { %3852 = vmatpush3.bf16.msra.mxu0 %v3851_v40  ;;  %1543 = vmatprep.mubr.f32.mxu0 %v4872_v12  ;;  %v3871_v40 = vpack.c.bf16 %v5086_v23, %v5070_v4  ;;  %v3873_v12 = vpack.c.bf16 %v5117_v56, %v5111_v29 }
  0x9b   :  { %3844 = vmatpush3.bf16.msra.mxu1 %v3843_v54  ;;  %3854 = vmatprep.subr.bf16.mxu0 %v3853_v63  ;;  %v6214_v54 = vld [vmem:[#allocation7_spill] sm:$0xff]  ;;  %v6215_v63 = vld [vmem:[#allocation12_spill] sm:$0xff] }
  0x9c   :  { %3878 = vmatprep.subr.bf16.mxu1 %v4778_v37 }
  0x9e   :  { %1401 = vmatmul.mubr.f32.vlgmr.msra.gmra.mrb[12].mxu1 %v5094_v30  ;;  %3856 = vmatpush3.bf16.msra.mxu0 %v3855_v20  ;;  %v3875_v20 = vpack.c.bf16 %v5143_v15, %v5140_v7 }
  0x9f   :  { %3880 = vmatpush3.bf16.msra.mxu1 %v6207_v25  ;;  %1406 = vmatprep.mubr.f32.mxu1 %v5103_v21 }
  0xa0   :  { %3858 = vmatprep.subr.bf16.mxu0 %v3857_v41  ;;  %3882 = vmatprep.subr.bf16.mxu1 %v6208_v43  ;;  %v6216_v41 = vld [vmem:[#allocation13_spill] sm:$0xff] }
  0xa2   :  { %1408 = vmatmul.mubr.f32.gmra.mrb[14].mxu1 %v5125_v28  ;;  %3860 = vmatpush3.bf16.msra.mxu0 %v3859_v3  ;;  %v6217_v3 = vand.u32 4294901760, %v4705_v32  ;;  %v106_v32 = vld [vmem:[%s5952_s1 + $0x280] sm:$0xff] }
  0xa3   :  { %3884 = vmatpush3.bf16.msra.mxu1 %v4810_v9  ;;  %3862 = vmatprep.subr.bf16.mxu0 %v3861_v52  ;;  %v6218_v52 = vand.u32 4294901760, %v4707_v8  ;;  %v107_v8 = vld [vmem:[%s5952_s1 + $0x288] sm:$0xff] }
  0xa4   :  { %3886 = vmatprep.subr.bf16.mxu1 %v4835_v61  ;;  %1659 = vmatprep.mubr.f32.mxu1 %v6209_v55  ;;  %v6220_v55 = vand.u32 4294901760, %v4718_v47  ;;  %v6224_v47 = vand.u32 4294901760, %v4812_v38  ;;  %v6227_v38 = vand.u32 4294901760, %v4840_v14  ;;  %v6229_v14 = vand.u32 4294901760, %v4855_v58 }
  0xa5   :  { %v6234_v58 = vand.u32 4294901760, %v6206_v26 }
  0xa6   :  { %3864 = vmatpush3.bf16.msra.mxu0 %v3863_v33  ;;  %v3909_v33 = vpack.c.bf16 %v6218_v52, %v6217_v3  ;;  %v90_v3 = vld [vmem:[%s5952_s1 + $0x200] sm:$0xff]  ;;  %v91_v52 = vld [vmem:[%s5952_s1 + $0x208] sm:$0xff] }
  0xa7   :  { %3888 = vmatpush3.bf16.msra.mxu1 %v6211_v13  ;;  %3866 = vmatprep.subr.bf16.mxu0 %v3865_v18  ;;  %v6219_v18 = vld [vmem:[#allocation14_spill] sm:$0xff] }
  0xa8   :  { %3890 = vmatprep.subr.bf16.mxu1 %v6213_v62 }
  0xaa   :  { %3868 = vmatpush3.bf16.msra.mxu0 %v3867_v48  ;;  %v6221_v48 = vand.u32 4294901760, %v4720_v17  ;;  %v6225_v17 = vand.u32 4294901760, %v4814_v19  ;;  %v1966_v19 = vand.u32 4294901760, %v90_v3 }
  0xab   :  { %3892 = vmatpush3.bf16.msra.mxu1 %v6214_v54  ;;  %3870 = vmatprep.subr.bf16.mxu0 %v3869_v0 }
  0xac   :  { %3894 = vmatprep.subr.bf16.mxu1 %v6215_v63  ;;  %v3911_v0 = vpack.c.bf16 %v6221_v48, %v6220_v55  ;;  %v1969_v48 = vand.u32 4294901760, %v91_v52 }
  0xae   :  { %3872 = vmatpush3.bf16.msra.mxu0 %v3871_v40  ;;  %v6222_v40 = vand.u32 4294901760, %v4784_v46  ;;  %v3915_v46 = vpack.c.bf16 %v6225_v17, %v6224_v47 }
  0xaf   :  { %3896 = vmatpush3.bf16.msra.mxu1 %v6216_v41  ;;  %3874 = vmatprep.subr.bf16.mxu0 %v3873_v12  ;;  %v6223_v12 = vand.u32 4294901760, %v4786_v51  ;;  %v2014_v51 = vand.u32 4294901760, %v106_v32 }
  0xb0   :  { %3898 = vmatprep.subr.bf16.mxu1 %v6219_v18 }
  0xb1   :  { %v3913_v57 = vpack.c.bf16 %v6223_v12, %v6222_v40  ;;  %v109_v40 = vld [vmem:[%s5952_s1 + $0x298] sm:$0xff]  ;;  %v6230_v12 = vld [vmem:[#allocation4_spill] sm:$0xff]  ;;  %v5300_v47 = vsub.f32 %v106_v32, %v2014_v51  ;;  %v6235_v32 = vand.u32 4294901760, %v4938_v27  ;;  %v6239_v27 = vand.u32 4294901760, %v5000_v31 }
  0xb2   :  { %3876 = vmatpush3.bf16.msra.mxu0 %v3875_v20  ;;  %v2017_v20 = vand.u32 4294901760, %v107_v8  ;;  %v6245_v31 = vand.u32 4294901760, %v5052_v24 }
  0xb3   :  { %3900 = vmatpush3.bf16.msra.mxu1 %v5016_v49  ;;  %3910 = vmatprep.subr.bf16.mxu0 %v3909_v33  ;;  %v6226_v33 = vand.u32 4294901760, %v4830_v50  ;;  %v6228_v50 = vand.u32 4294901760, %v4853_v45  ;;  %v6233_v45 = vand.u32 4294901760, %v6205_v6  ;;  %v6238_v6 = vand.u32 4294901760, %v4998_v35 }
  0xb4   :  { %3902 = vmatprep.subr.bf16.mxu1 %v5048_v11  ;;  %v5302_v17 = vsub.f32 %v107_v8, %v2017_v20  ;;  %v6236_v8 = vand.u32 4294901760, %v4953_v53  ;;  %v6240_v53 = vand.u32 4294901760, %v5005_v16  ;;  %v6244_v35 = vand.u32 4294901760, %v6212_v2 }
  0xb5   :  { %1546 = vmatmul.mubr.f32.vlgmr.msra.gmra.mrb[16].mxu0 %v5123_v22  ;;  %v3917_v55 = vpack.c.bf16 %v6227_v38, %v6226_v33  ;;  %v6231_v33 = vand.u32 4294901760, %v6203_v5  ;;  %v6232_v38 = vand.u32 4294901760, %v6204_v44  ;;  %v92_v5 = vld [vmem:[%s5952_s1 + $0x210] sm:$0xff]  ;;  %v6237_v44 = vand.u32 4294901760, %v4995_v10 }
  0xb6   :  { %3912 = vmatpush3.bf16.msra.mxu0 %v3911_v0  ;;  %1552 = vmatprep.mubr.f32.mxu0 %v5135_v60  ;;  %v108_v0 = vld [vmem:[%s5952_s1 + $0x290] sm:$0xff]  ;;  %v6243_v10 = vand.u32 4294901760, %v6210_v36  ;;  %v5348_v16 = vpack.c.bf16 %v6245_v31, %v6244_v35  ;;  %v6247_v36 = vand.u32 4294901760, %v5070_v4  ;;  %v6248_v2 = vand.u32 4294901760, %v5086_v23 }
  0xb7   :  { %3904 = vmatpush3.bf16.msra.mxu1 %v5068_v42  ;;  %3914 = vmatprep.subr.bf16.mxu0 %v3913_v57  ;;  %v3919_v57 = vpack.c.bf16 %v6229_v14, %v6228_v50  ;;  %v3921_v28 = vpack.c.bf16 %v6232_v38, %v6231_v33  ;;  %v3925_v50 = vpack.c.bf16 %v6236_v8, %v6235_v32  ;;  %v2020_v14 = vand.u32 4294901760, %v108_v0 }
  0xb8   :  { %3906 = vmatprep.subr.bf16.mxu1 %v5156_v34  ;;  %v3927_v26 = vpack.c.bf16 %v6238_v6, %v6237_v44  ;;  %v5332_v33 = vsub.f32 %v90_v3, %v1966_v19  ;;  %v5334_v38 = vsub.f32 %v91_v52, %v1969_v48  ;;  %v110_v3 = vld [vmem:[%s5952_s1 + $0x2a0] sm:$0xff]  ;;  %v6072_v52 = vand.u32 4294901760, %v5302_v17 }
  0xb9   :  { %1555 = vmatmul.mubr.f32.gmra.mrb[18].mxu0 %v5160_v39  ;;  %v5362_v24 = vpack.c.bf16 %v6248_v2, %v6247_v36  ;;  %v6250_v8 = vand.u32 4294901760, %v5117_v56  ;;  %v1972_v6 = vand.u32 4294901760, %v92_v5  ;;  %v5377_v23 = vsub.f32 %v108_v0, %v2020_v14  ;;  %v111_v56 = vld [vmem:[%s5952_s1 + $0x2a8] sm:$0xff] }
  0xba   :  { %3916 = vmatpush3.bf16.msra.mxu0 %v3915_v46  ;;  %1840 = vmatprep.mubr.f32.mxu0 %v6230_v12  ;;  %v3923_v46 = vpack.c.bf16 %v6234_v58, %v6233_v45  ;;  %v6241_v45 = vand.u32 4294901760, %v5123_v22  ;;  %v6242_v58 = vand.u32 4294901760, %v5027_v59  ;;  %v6073_v22 = vand.u32 4294901760, %v5300_v47 }
  0xbb   :  { %3908 = vmatpush3.bf16.msra.mxu1 %v5185_v1  ;;  %3918 = vmatprep.subr.bf16.mxu0 %v3917_v55  ;;  %v2023_v1 = vand.u32 4294901760, %v109_v40  ;;  %v3929_v55 = vpack.c.bf16 %v6240_v53, %v6239_v27  ;;  %v6246_v59 = vand.u32 4294901760, %v5135_v60  ;;  %v6251_v60 = vand.u32 4294901760, %v5140_v7 }
  0xbc   :  { %3942 = vmatprep.subr.bf16.mxu1 %v4778_v37  ;;  %v93_v37 = vld [vmem:[%s5952_s1 + $0x218] sm:$0xff]  ;;  %v5342_v32 = vpack.c.bf16 %v6243_v10, %v6242_v58  ;;  %v6069_v7 = vand.u32 4294901760, %v5332_v33  ;;  %v5393_v0 = vpack.c.bf16 %v1969_v48, %v1966_v19  ;;  %v2029_v48 = vand.u32 4294901760, %v111_v56  ;;  %v112_v58 = vld [vmem:[%s5952_s1 + $0x2b0] sm:$0xff]  ;;  %v19_v10 = vld [vmem:[%s5953_s0 + $0x28] sm:$0xff] }
  0xbd   :  { %v1975_v27 = vand.u32 4294901760, %v93_v37  ;;  %v5379_v53 = vsub.f32 %v109_v40, %v2023_v1  ;;  %v95_v40 = vld [vmem:[%s5952_s1 + $0x228] sm:$0xff]  ;;  %v2032_v36 = vand.u32 4294901760, %v112_v58  ;;  %v5434_v2 = vand.u32 4294901760, %v19_v10 }
  0xbe   :  { %1663 = vmatmul.mubr.f32.vlgmr.msra.gmra.mrb[16].mxu1 %v6241_v45  ;;  %3920 = vmatpush3.bf16.msra.mxu0 %v3919_v57  ;;  %v6249_v57 = vand.u32 4294901760, %v5111_v29  ;;  %v5384_v29 = vpack.c.bf16 %v2017_v20, %v2014_v51  ;;  %v2026_v45 = vand.u32 4294901760, %v110_v3  ;;  %6254 = vst [vmem:[#allocation5_spill] sm:$0xff] %v5393_v0  ;;  %v2208_v51 = vsub.f32 %v5300_v47, %v6073_v22 }
  0xbf   :  { %3944 = vmatpush3.bf16.msra.mxu1 %v6207_v25  ;;  %1670 = vmatprep.mubr.f32.mxu1 %v6246_v59  ;;  %v6252_v25 = vand.u32 4294901760, %v5143_v15  ;;  %v6066_v15 = vand.u32 4294901760, %v5334_v38  ;;  %v2215_v20 = vsub.f32 %v5302_v17, %v6072_v52  ;;  %v5409_v19 = vsub.f32 %v93_v37, %v1975_v27  ;;  %6256 = vst [vmem:[#allocation10_spill] sm:$0xff] %v5434_v2 }
  0xc0   :  { %v5368_v44 = vpack.c.bf16 %v6250_v8, %v6249_v57  ;;  %3922 = vmatprep.subr.bf16.mxu0 %v3921_v28  ;;  %3946 = vmatprep.subr.bf16.mxu1 %v6208_v43  ;;  %v94_v28 = vld [vmem:[%s5952_s1 + $0x220] sm:$0xff]  ;;  %v6253_v43 = vand.u32 4294901760, %v5160_v39  ;;  %v5405_v39 = vpack.c.bf16 %v2023_v1, %v2020_v14  ;;  %v5418_v35 = vpack.c.bf16 %v1975_v27, %v1972_v6  ;;  %v113_v1 = vld [vmem:[%s5952_s1 + $0x2b8] sm:$0xff]  ;;  %v96_v8 = vld [vmem:[%s5952_s1 + $0x230] sm:$0xff] }
  0xc1   :  { %v5375_v4 = vpack.c.bf16 %v6252_v25, %v6251_v60  ;;  %v6062_v14 = vand.u32 4294901760, %v5379_v53  ;;  %v1981_v37 = vand.u32 4294901760, %v95_v40  ;;  %v2209_v31 = vand.u32 4294901760, %v2208_v51  ;;  %v97_v25 = vld [vmem:[%s5952_s1 + $0x238] sm:$0xff] }
  0xc2   :  { %1674 = vmatmul.mubr.f32.gmra.mrb[18].mxu1 %v6253_v43  ;;  %3924 = vmatpush3.bf16.msra.mxu0 %v3923_v46  ;;  %6255 = vst [vmem:[#allocation8_spill] sm:$0xff] %v5405_v39  ;;  %v5407_v46 = vsub.f32 %v92_v5, %v1972_v6  ;;  %v5426_v5 = vsub.f32 %v110_v3, %v2026_v45  ;;  %v2216_v59 = vand.u32 4294901760, %v2215_v20  ;;  %v2035_v57 = vand.u32 4294901760, %v113_v1 }
  0xc3   :  { %3948 = vmatpush3.bf16.msra.mxu1 %v4810_v9  ;;  %3926 = vmatprep.subr.bf16.mxu0 %v3925_v50  ;;  %v1978_v9 = vand.u32 4294901760, %v94_v28  ;;  %v6065_v50 = vand.u32 4294901760, %v5377_v23  ;;  %v5437_v3 = vpack.c.bf16 %v2029_v48, %v2026_v45  ;;  %v6064_v27 = vand.u32 4294901760, %v5409_v19 }
  0xc4   :  { %3950 = vmatprep.subr.bf16.mxu1 %v4835_v61  ;;  %1951 = vmatprep.mubr.f32.mxu1 %v6230_v12  ;;  %v2096_v61 = vsub.f32 %v5332_v33, %v6069_v7  ;;  %v2103_v12 = vsub.f32 %v5334_v38, %v6066_v15  ;;  %v6063_v6 = vand.u32 4294901760, %v5407_v46  ;;  %v5460_v43 = vsub.f32 %v95_v40, %v1981_v37 }
  0xc5   :  { %6257 = vst [vmem:[#allocation11_spill] sm:$0xff] %v5437_v3  ;;  %v5447_v60 = vsub.f32 %v94_v28, %v1978_v9  ;;  %v5458_v45 = vpack.c.bf16 %v1981_v37, %v1978_v9  ;;  %v5463_v28 = vpack.c.bf16 %v2216_v59, %v2209_v31  ;;  %v5465_v51 = vsub.f32 %v112_v58, %v2032_v36  ;;  %v115_v9 = vld [vmem:[%s5952_s1 + $0x2c8] sm:$0xff] }
  0xc6   :  { %3928 = vmatpush3.bf16.msra.mxu0 %v3927_v26  ;;  %v5445_v26 = vsub.f32 %v111_v56, %v2029_v48  ;;  %v2104_v56 = vand.u32 4294901760, %v2103_v12  ;;  %v1984_v20 = vand.u32 4294901760, %v96_v8  ;;  %v114_v48 = vld [vmem:[%s5952_s1 + $0x2c0] sm:$0xff]  ;;  %v5474_v40 = vsub.f32 %v19_v10, %v5434_v2 }
  0xc7   :  { %3952 = vmatpush3.bf16.msra.mxu1 %v6211_v13  ;;  %3930 = vmatprep.subr.bf16.mxu0 %v3929_v55  ;;  %v2222_v13 = vsub.f32 %v5377_v23, %v6065_v50  ;;  %v2229_v55 = vsub.f32 %v5379_v53, %v6062_v14  ;;  %6258 = vst [vmem:[#allocation2_spill] sm:$0xff] %v5458_v45  ;;  %v1987_v58 = vand.u32 4294901760, %v97_v25  ;;  %v6068_v31 = vand.u32 4294901760, %v5426_v5 }
  0xc8   :  { %3954 = vmatprep.subr.bf16.mxu1 %v6213_v62  ;;  %v2097_v62 = vand.u32 4294901760, %v2096_v61  ;;  %v2110_v37 = vsub.f32 %v5407_v46, %v6063_v6  ;;  %v2117_v61 = vsub.f32 %v5409_v19, %v6064_v27  ;;  %v5491_v59 = vsub.f32 %v113_v1, %v2035_v57  ;;  %v98_v6 = vld [vmem:[%s5952_s1 + $0x240] sm:$0xff] }
  0xc9   :  { %v2223_v12 = vand.u32 4294901760, %v2222_v13  ;;  %v2230_v10 = vand.u32 4294901760, %v2229_v55  ;;  %v2041_v14 = vand.u32 4294901760, %v115_v9  ;;  %v5497_v27 = vsub.f32 %v96_v8, %v1984_v20 }
  0xca   :  { %3932 = vmatpush3.bf16.msra.mxu0 %v5342_v32  ;;  %v5478_v32 = vpack.c.bf16 %v2035_v57, %v2032_v36  ;;  %v2038_v36 = vand.u32 4294901760, %v114_v48  ;;  %v6070_v13 = vand.u32 4294901760, %v5447_v60  ;;  %v6071_v55 = vand.u32 4294901760, %v5460_v43 }
  0xcb   :  { %3956 = vmatpush3.bf16.msra.mxu1 %v6214_v54  ;;  %3934 = vmatprep.subr.bf16.mxu0 %v5348_v16  ;;  %v6067_v54 = vand.u32 4294901760, %v5445_v26  ;;  %v5489_v16 = vpack.c.bf16 %v2104_v56, %v2097_v62  ;;  %6260 = vst [vmem:[#allocation15_spill] sm:$0xff] %v5497_v27  ;;  %v6074_v1 = vand.u32 4294901760, %v5474_v40  ;;  %v5507_v57 = vpack.c.bf16 %v1987_v58, %v1984_v20 }
  0xcc   :  { %6259 = vst [vmem:[#allocation3_spill] sm:$0xff] %v5478_v32  ;;  %3958 = vmatprep.subr.bf16.mxu1 %v6215_v63  ;;  %v99_v63 = vld [vmem:[%s5952_s1 + $0x248] sm:$0xff]  ;;  %v5509_v62 = vsub.f32 %v97_v25, %v1987_v58  ;;  %v2118_v8 = vand.u32 4294901760, %v2117_v61  ;;  %v5512_v56 = vpack.c.bf16 %v2230_v10, %v2223_v12  ;;  %v2236_v50 = vsub.f32 %v5426_v5, %v6068_v31  ;;  %v116_v25 = vld [vmem:[%s5952_s1 + $0x2d0] sm:$0xff] }
  0xcd   :  { %6261 = vst [vmem:[#allocation9_spill] sm:$0xff] %v5507_v57  ;;  %v1990_v15 = vand.u32 4294901760, %v98_v6  ;;  %v1993_v20 = vand.u32 4294901760, %v99_v63  ;;  %v6077_v58 = vand.u32 4294901760, %v5465_v51  ;;  %v2124_v61 = vsub.f32 %v5447_v60, %v6070_v13 }
  0xce   :  { %3936 = vmatpush3.bf16.msra.mxu0 %v5362_v24  ;;  %6262 = vst [vmem:[#allocation16_spill] sm:$0xff] %v5509_v62  ;;  %v2111_v24 = vand.u32 4294901760, %v2110_v37  ;;  %v6076_v37 = vand.u32 4294901760, %v5491_v59  ;;  %v2131_v12 = vsub.f32 %v5460_v43, %v6071_v55  ;;  %v5547_v7 = vsub.f32 %v115_v9, %v2041_v14 }
  0xcf   :  { %3960 = vmatpush3.bf16.msra.mxu1 %v6216_v41  ;;  %3938 = vmatprep.subr.bf16.mxu0 %v5368_v44  ;;  %v2243_v41 = vsub.f32 %v5445_v26, %v6067_v54  ;;  %v5520_v44 = vpack.c.bf16 %v2041_v14, %v2038_v36  ;;  %v2064_v54 = vsub.f32 %v5474_v40, %v6074_v1  ;;  %v6075_v13 = vand.u32 4294901760, %v5509_v62 }
  0xd0   :  { %3962 = vmatprep.subr.bf16.mxu1 %v6219_v18  ;;  %v117_v18 = vld [vmem:[%s5952_s1 + $0x2d8] sm:$0xff]  ;;  %v5543_v31 = vpack.c.bf16 %v2118_v8, %v2111_v24  ;;  %v2237_v55 = vand.u32 4294901760, %v2236_v50  ;;  %v2044_v22 = vand.u32 4294901760, %v116_v25  ;;  %v5552_v1 = vpack.c.bf16 %v1993_v20, %v1990_v15 }
  0xd1   :  { %6263 = vst [vmem:[#allocation6_spill] sm:$0xff] %v5520_v44  ;;  %v2244_v52 = vand.u32 4294901760, %v2243_v41  ;;  %v2047_v10 = vand.u32 4294901760, %v117_v18  ;;  %v2257_v14 = vsub.f32 %v5491_v59, %v6076_v37  ;;  %v101_v50 = vld [vmem:[%s5952_s1 + $0x258] sm:$0xff]  ;;  %v6265_v9 = vand.u32 4294901760, %v5497_v27 }
  0xd2   :  { %3940 = vmatpush3.bf16.msra.mxu0 %v5375_v4  ;;  %v5545_v4 = vsub.f32 %v114_v48, %v2038_v36  ;;  %6264 = vst [vmem:[#allocation7_spill] sm:$0xff] %v5552_v1  ;;  %v2250_v48 = vsub.f32 %v5465_v51, %v6077_v58  ;;  %v2065_v24 = vand.u32 4294901760, %v2064_v54  ;;  %v5575_v8 = vsub.f32 %v99_v63, %v1993_v20  ;;  %v6267_v37 = vld [vmem:[#allocation17_spill] sm:$0xff] }
  0xd3   :  { %3964 = vmatpush3.bf16.msra.mxu1 %v5016_v49  ;;  %3974 = vmatprep.subr.bf16.mxu0 %v5384_v29  ;;  %v5554_v49 = vsub.f32 %v98_v6, %v1990_v15  ;;  %v2125_v15 = vand.u32 4294901760, %v2124_v61  ;;  %v2132_v6 = vand.u32 4294901760, %v2131_v12  ;;  %v2138_v36 = vsub.f32 %v5497_v27, %v6265_v9  ;;  %v118_v61 = vld [vmem:[%s5952_s1 + $0x2e0] sm:$0xff]  ;;  %v119_v12 = vld [vmem:[%s5952_s1 + $0x2e8] sm:$0xff] }
  0xd4   :  { %3966 = vmatprep.subr.bf16.mxu1 %v5048_v11  ;;  %v100_v11 = vld [vmem:[%s5952_s1 + $0x250] sm:$0xff]  ;;  %v2145_v41 = vsub.f32 %v5509_v62, %v6075_v13  ;;  %v5589_v63 = vpack.c.bf16 %v2244_v52, %v2237_v55  ;;  %v5591_v20 = vpack.c.bf16 %v2047_v10, %v2044_v22  ;;  %v1999_v13 = vand.u32 4294901760, %v101_v50 }
  0xd5   :  { %1842 = vmatmul.mubr.f32.vlgmr.msra.gmra.mrb[20].mxu0 %v5094_v30  ;;  %v1996_v9 = vand.u32 4294901760, %v100_v11  ;;  %v5594_v58 = vsub.f32 %v116_v25, %v2044_v22  ;;  %v2258_v62 = vand.u32 4294901760, %v2257_v14  ;;  %v5605_v52 = vpack.c.bf16 %v2132_v6, %v2125_v15  ;;  %v6269_v25 = vld [vmem:[#allocation18_spill] sm:$0xff] }
  0xd6   :  { %3976 = vmatpush3.bf16.msra.mxu0 %v5393_v0  ;;  %1847 = vmatprep.mubr.f32.mxu0 %v5103_v21  ;;  %6266 = vst [vmem:[#allocation12_spill] sm:$0xff] %v5591_v20  ;;  %v2251_v0 = vand.u32 4294901760, %v2250_v48  ;;  %v2139_v55 = vand.u32 4294901760, %v2138_v36  ;;  %v2050_v54 = vand.u32 4294901760, %v118_v61  ;;  %v2053_v22 = vand.u32 4294901760, %v119_v12 }
  0xd7   :  { %3968 = vmatpush3.bf16.msra.mxu1 %v5068_v42  ;;  %3978 = vmatprep.subr.bf16.mxu0 %v5405_v39  ;;  %v5596_v39 = vsub.f32 %v117_v18, %v2047_v10  ;;  %v102_v42 = vld [vmem:[%s5952_s1 + $0x260] sm:$0xff]  ;;  %v2146_v18 = vand.u32 4294901760, %v2145_v41  ;;  %v6270_v10 = vand.u32 4294901760, %v5545_v4  ;;  %v6271_v14 = vand.u32 4294901760, %v5547_v7 }
  0xd8   :  { %3970 = vmatprep.subr.bf16.mxu1 %v5156_v34  ;;  %v103_v34 = vld [vmem:[%s5952_s1 + $0x268] sm:$0xff]  ;;  %v6088_v15 = vand.u32 4294901760, %v5554_v49  ;;  %v5617_v6 = vpack.c.bf16 %v1999_v13, %v1996_v9  ;;  %v5619_v36 = vsub.f32 %v100_v11, %v1996_v9  ;;  %v5623_v41 = vsub.f32 %v101_v50, %v1999_v13  ;;  %v18_v9 = vld [vmem:[%s5953_s0 + $0x20] sm:$0xff] }
  0xd9   :  { %1849 = vmatmul.mubr.f32.gmra.mrb[22].mxu0 %v6267_v37  ;;  %6268 = vst [vmem:[#allocation13_spill] sm:$0xff] %v5596_v39  ;;  %v2264_v48 = vsub.f32 %v5545_v4, %v6270_v10  ;;  %v2271_v27 = vsub.f32 %v5547_v7, %v6271_v14  ;;  %v5629_v14 = vld [vmem:[%s5952_s1 + $0x2f0] sm:$0xff]  ;;  %v5641_v13 = vsub.f32 %v118_v61, %v2050_v54  ;;  %v6095_v50 = vand.u32 4294901760, %v5596_v39 }
  0xda   :  { %3980 = vmatpush3.bf16.msra.mxu0 %v5418_v35  ;;  %2066 = vmatprep.mubr.f32.mxu0 %v2065_v24  ;;  %v2002_v24 = vand.u32 4294901760, %v102_v42  ;;  %6272 = vst [vmem:[#allocation14_spill] sm:$0xff] %v5623_v41  ;;  %v5651_v11 = vpack.c.bf16 %v2146_v18, %v2139_v55  ;;  %v2152_v61 = vsub.f32 %v5554_v49, %v6088_v15  ;;  %v5670_v55 = vld [vmem:[%s5952_s1 + $0x270] sm:$0xff]  ;;  %v5685_v15 = vand.u32 4294901760, %v18_v9 }
  0xdb   :  { %3972 = vmatpush3.bf16.msra.mxu1 %v6269_v25  ;;  %3982 = vmatprep.subr.bf16.mxu0 %v5437_v3  ;;  %v2005_v25 = vand.u32 4294901760, %v103_v34  ;;  %v5621_v3 = vpack.c.bf16 %v2258_v62, %v2251_v0  ;;  %v5639_v0 = vpack.c.bf16 %v2053_v22, %v2050_v54  ;;  %6273 = vst [vmem:[#allocation4_spill] sm:$0xff] %v5641_v13  ;;  %v2272_v10 = vand.u32 4294901760, %v2271_v27 }
  0xdc   :  { %4006 = vmatprep.subr.bf16.mxu1 %v5463_v28  ;;  %v5634_v28 = vld [vmem:[%s5952_s1 + $0x2f8] sm:$0xff]  ;;  %v5643_v62 = vsub.f32 %v119_v12, %v2053_v22  ;;  %6276 = vst [vmem:[#allocation17_spill] sm:$0xff] %v5685_v15 }
  0xdd   :  { %v25_v12 = vld [vmem:[%s5953_s0 + $0x58] sm:$0xff]  ;;  %v5661_v54 = vpack.c.bf16 %v2005_v25, %v2002_v24  ;;  %v2059_v27 = vand.u32 4294901760, %v5634_v28  ;;  %v5677_v18 = vsub.f32 %v103_v34, %v2005_v25 }
  0xde   :  { %1953 = vmatmul.mubr.f32.vlgmr.msra.gmra.mrb[20].mxu1 %v5094_v30  ;;  %3984 = vmatpush3.bf16.msra.mxu0 %v5458_v45  ;;  %v2265_v30 = vand.u32 4294901760, %v2264_v48  ;;  %v5675_v22 = vld [vmem:[%s5952_s1 + $0x278] sm:$0xff]  ;;  %v6275_v48 = vand.u32 4294901760, %v5594_v58  ;;  %v5694_v45 = vand.u32 4294901760, %v25_v12 }
  0xdf   :  { %4008 = vmatpush3.bf16.msra.mxu1 %v5489_v16  ;;  %1958 = vmatprep.mubr.f32.mxu1 %v5103_v21  ;;  %v5663_v16 = vsub.f32 %v102_v42, %v2002_v24  ;;  %v2056_v21 = vand.u32 4294901760, %v5629_v14  ;;  %v5708_v34 = vsub.f32 %v5634_v28, %v2059_v27 }
  0xe0   :  { %3986 = vmatprep.subr.bf16.mxu0 %v5478_v32  ;;  %4010 = vmatprep.subr.bf16.mxu1 %v5512_v56  ;;  %v6274_v56 = vand.u32 4294901760, %v5575_v8  ;;  %v2278_v24 = vsub.f32 %v5594_v58, %v6275_v48  ;;  %v2285_v32 = vsub.f32 %v5596_v39, %v6095_v50  ;;  %6277 = vst [vmem:[#allocation18_spill] sm:$0xff] %v5694_v45  ;;  %v2153_v48 = vand.u32 4294901760, %v2152_v61 }
  0xe1   :  { %v2011_v50 = vand.u32 4294901760, %v5675_v22  ;;  %v5705_v25 = vsub.f32 %v5629_v14, %v2056_v21  ;;  %v5714_v61 = vsub.f32 %v18_v9, %v5685_v15  ;;  %v6279_v14 = vand.u32 4294901760, %v5619_v36 }
  0xe2   :  { %v2159_v42 = vsub.f32 %v5575_v8, %v6274_v56  ;;  %1960 = vmatmul.mubr.f32.gmra.mrb[22].mxu1 %v6267_v37  ;;  %3988 = vmatpush3.bf16.msra.mxu0 %v5507_v57  ;;  %v24_v56 = vld [vmem:[%s5953_s0 + $0x50] sm:$0xff]  ;;  %v4021_v37 = vpack.c.bf16 %v2272_v10, %v2265_v30  ;;  %v2008_v57 = vand.u32 4294901760, %v5670_v55  ;;  %v2279_v30 = vand.u32 4294901760, %v2278_v24 }
  0xe3   :  { %4012 = vmatpush3.bf16.msra.mxu1 %v5543_v31  ;;  %3990 = vmatprep.subr.bf16.mxu0 %v5520_v44  ;;  %v5716_v44 = vand.u32 4294901760, %v24_v56  ;;  %v2166_v28 = vsub.f32 %v5619_v36, %v6279_v14  ;;  %v6280_v39 = vand.u32 4294901760, %v5623_v41 }
  0xe4   :  { %4014 = vmatprep.subr.bf16.mxu1 %v5589_v63  ;;  %2317 = vmatprep.mubr.f32.mxu1 %v5434_v2  ;;  %v2160_v10 = vand.u32 4294901760, %v2159_v42  ;;  %v2286_v63 = vand.u32 4294901760, %v2285_v32  ;;  %v5726_v2 = vsub.f32 %v25_v12, %v5694_v45  ;;  %v5731_v9 = vsub.f32 %v5670_v55, %v2008_v57 }
  0xe5   :  { %6278 = vst [vmem:[#allocation19_spill] sm:$0xff] %v5716_v44  ;;  %v2173_v31 = vsub.f32 %v5623_v41, %v6280_v39  ;;  %v5734_v32 = vsub.f32 %v5675_v22, %v2011_v50  ;;  %v6282_v39 = vand.u32 4294901760, %v5641_v13  ;;  %v6111_v55 = vand.u32 4294901760, %v5705_v25 }
  0xe6   :  { %3992 = vmatpush3.bf16.msra.mxu0 %v5552_v1  ;;  %v4023_v22 = vpack.c.bf16 %v2160_v10, %v2153_v48  ;;  %v5747_v1 = vpack.c.bf16 %v2059_v27, %v2056_v21  ;;  %v6112_v42 = vand.u32 4294901760, %v5714_v61  ;;  %v5751_v24 = vsub.f32 %v24_v56, %v5716_v44 }
  0xe7   :  { %4016 = vmatpush3.bf16.msra.mxu1 %v5605_v52  ;;  %3994 = vmatprep.subr.bf16.mxu0 %v5591_v20  ;;  %6281 = vst [vmem:[#allocation20_spill] sm:$0xff] %v5734_v32  ;;  %v2292_v12 = vsub.f32 %v5641_v13, %v6282_v39  ;;  %v6283_v52 = vand.u32 4294901760, %v5643_v62  ;;  %v6110_v20 = vand.u32 4294901760, %v5708_v34  ;;  %v2167_v39 = vand.u32 4294901760, %v2166_v28 }
  0xe8   :  { %4018 = vmatprep.subr.bf16.mxu1 %v5621_v3  ;;  %v4025_v3 = vpack.c.bf16 %v2286_v63, %v2279_v30  ;;  %v2174_v13 = vand.u32 4294901760, %v2173_v31  ;;  %v6113_v41 = vand.u32 4294901760, %v5726_v2  ;;  %v6284_v48 = vand.u32 4294901760, %v5663_v16 }
  0xe9   :  { %v2299_v14 = vsub.f32 %v5643_v62, %v6283_v52  ;;  %v6285_v27 = vand.u32 4294901760, %v5677_v18  ;;  %v6114_v10 = vand.u32 4294901760, %v5731_v9  ;;  %v6115_v30 = vand.u32 4294901760, %v5734_v32 }
  0xea   :  { %3996 = vmatpush3.bf16.msra.mxu0 %v5617_v6  ;;  %v2180_v21 = vsub.f32 %v5663_v16, %v6284_v48  ;;  %v2293_v31 = vand.u32 4294901760, %v2292_v12  ;;  %v2313_v28 = vsub.f32 %v5708_v34, %v6110_v20  ;;  %v2070_v52 = vsub.f32 %v5714_v61, %v6112_v42 }
  0xeb   :  { %4020 = vmatpush3.bf16.msra.mxu1 %v5651_v11  ;;  %3998 = vmatprep.subr.bf16.mxu0 %v5639_v0  ;;  %v2187_v56 = vsub.f32 %v5677_v18, %v6285_v27  ;;  %v2300_v63 = vand.u32 4294901760, %v2299_v14  ;;  %v2306_v11 = vsub.f32 %v5705_v25, %v6111_v55  ;;  %v5776_v27 = vpack.c.bf16 %v2011_v50, %v2008_v57 }
  0xec   :  { %4022 = vmatprep.subr.bf16.mxu1 %v4021_v37  ;;  %v4027_v37 = vpack.c.bf16 %v2174_v13, %v2167_v39  ;;  %v4037_v12 = vpack.c.bf16 %v5302_v17, %v5300_v47  ;;  %v2079_v14 = vsub.f32 %v5726_v2, %v6113_v41  ;;  %v2181_v20 = vand.u32 4294901760, %v2180_v21 }
  0xed   :  { %v2188_v55 = vand.u32 4294901760, %v2187_v56  ;;  %v2194_v42 = vsub.f32 %v5731_v9, %v6114_v10  ;;  %v2201_v57 = vsub.f32 %v5734_v32, %v6115_v30  ;;  %v4029_v13 = vpack.c.bf16 %v2300_v63, %v2293_v31 }
  0xee   :  { %4000 = vmatpush3.bf16.msra.mxu0 %v5661_v54  ;;  %v2307_v50 = vand.u32 4294901760, %v2306_v11  ;;  %v2314_v39 = vand.u32 4294901760, %v2313_v28  ;;  %v2071_v48 = vand.u32 4294901760, %v2070_v52  ;;  %v6286_v41 = vand.u32 4294901760, %v5751_v24 }
  0xef   :  { %4024 = vmatpush3.bf16.msra.mxu1 %v4023_v22  ;;  %4002 = vmatprep.subr.bf16.mxu0 %v5747_v1  ;;  %v4039_v21 = vpack.c.bf16 %v5334_v38, %v5332_v33  ;;  %v2080_v56 = vand.u32 4294901760, %v2079_v14  ;;  %v4031_v10 = vpack.c.bf16 %v2188_v55, %v2181_v20  ;;  %v2195_v31 = vand.u32 4294901760, %v2194_v42 }
  0xf0   :  { %4026 = vmatprep.subr.bf16.mxu1 %v4025_v3  ;;  %v2085_v22 = vsub.f32 %v5751_v24, %v6286_v41  ;;  %v4041_v3 = vpack.c.bf16 %v5379_v53, %v5377_v23  ;;  %v2202_v63 = vand.u32 4294901760, %v2201_v57  ;;  %v4033_v11 = vpack.c.bf16 %v2314_v39, %v2307_v50  ;;  %v6290_v57 = vld [vmem:[#allocation8_spill] sm:$0xff]  ;;  %v6291_v50 = vld [vmem:[#allocation13_spill] sm:$0xff] }
  0xf1   :  { %v4043_v41 = vpack.c.bf16 %v5409_v19, %v5407_v46  ;;  %v4045_v20 = vpack.c.bf16 %v5445_v26, %v5426_v5  ;;  %v4047_v42 = vpack.c.bf16 %v5460_v43, %v5447_v60  ;;  %v4049_v55 = vpack.c.bf16 %v5491_v59, %v5465_v51 }
  0xf2   :  { %4004 = vmatpush3.bf16.msra.mxu0 %v5776_v27  ;;  %v2086_v28 = vand.u32 4294901760, %v2085_v22  ;;  %v4035_v52 = vpack.c.bf16 %v2202_v63, %v2195_v31  ;;  %v4053_v14 = vpack.c.bf16 %v5547_v7, %v5545_v4  ;;  %v4057_v39 = vpack.c.bf16 %v6291_v50, %v5594_v58  ;;  %v6292_v22 = vld [vmem:[#allocation11_spill] sm:$0xff]  ;;  %v6295_v31 = vld [vmem:[#allocation2_spill] sm:$0xff]  ;;  %v6296_v63 = vld [vmem:[#allocation4_spill] sm:$0xff] }
  0xf3   :  { %4028 = vmatpush3.bf16.msra.mxu1 %v4027_v37  ;;  %4038 = vmatprep.subr.bf16.mxu0 %v4037_v12  ;;  %v6289_v12 = vld [vmem:[#allocation5_spill] sm:$0xff] }
  0xf4   :  { %4030 = vmatprep.subr.bf16.mxu1 %v4029_v13  ;;  %v4055_v13 = vpack.c.bf16 %v5575_v8, %v5554_v49 }
  0xf5   :  { %2072 = vmatmul.mubr.f32.vlgmr.msra.gmra.mrb[24].mxu0 %v2071_v48  ;;  %v6288_v48 = vld [vmem:[#allocation16_spill] sm:$0xff] }
  0xf6   :  { %4040 = vmatpush3.bf16.msra.mxu0 %v4039_v21  ;;  %2081 = vmatprep.mubr.f32.mxu0 %v2080_v56  ;;  %v6293_v21 = vand.u32 4294901760, %v5474_v40  ;;  %v6294_v56 = vld [vmem:[#allocation14_spill] sm:$0xff] }
  0xf7   :  { %4032 = vmatpush3.bf16.msra.mxu1 %v4031_v10  ;;  %4042 = vmatprep.subr.bf16.mxu0 %v4041_v3  ;;  %v6287_v10 = vld [vmem:[#allocation15_spill] sm:$0xff]  ;;  %v4059_v3 = vpack.c.bf16 %v6294_v56, %v5619_v36 }
  0xf8   :  { %4034 = vmatprep.subr.bf16.mxu1 %v4033_v11  ;;  %v4051_v37 = vpack.c.bf16 %v6288_v48, %v6287_v10  ;;  %v4061_v11 = vpack.c.bf16 %v5643_v62, %v6296_v63 }
  0xf9   :  { %2087 = vmatmul.mubr.f32.gmra.mrb[26].mxu0 %v2086_v28  ;;  %v6297_v28 = vld [vmem:[#allocation3_spill] sm:$0xff] }
  0xfa   :  { %4044 = vmatpush3.bf16.msra.mxu0 %v4043_v41  ;;  %2461 = vmatprep.mubr.f32.mxu0 %v5474_v40 }
  0xfb   :  { %4036 = vmatpush3.bf16.msra.mxu1 %v4035_v52  ;;  %4046 = vmatprep.subr.bf16.mxu0 %v4045_v20  ;;  %v4063_v20 = vpack.c.bf16 %v5677_v18, %v5663_v16 }
  0xfc   :  { %4070 = vmatprep.subr.bf16.mxu1 %v5384_v29 }
  0xfe   :  { %2319 = vmatmul.mubr.f32.vlgmr.msra.gmra.mrb[24].mxu1 %v5685_v15  ;;  %4048 = vmatpush3.bf16.msra.mxu0 %v4047_v42  ;;  %v6298_v42 = vld [vmem:[#allocation9_spill] sm:$0xff] }
  0xff   :  { %4072 = vmatpush3.bf16.msra.mxu1 %v6289_v12  ;;  %2324 = vmatprep.mubr.f32.mxu1 %v5694_v45  ;;  %v6305_v45 = vand.u32 4294901760, %v5334_v38  ;;  %v6309_v38 = vand.u32 4294901760, %v5409_v19  ;;  %v6312_v19 = vand.u32 4294901760, %v5447_v60  ;;  %v6318_v60 = vand.u32 4294901760, %v6287_v10 }
 0x100   :  { %4050 = vmatprep.subr.bf16.mxu0 %v4049_v55  ;;  %4074 = vmatprep.subr.bf16.mxu1 %v6290_v57  ;;  %v4065_v55 = vpack.c.bf16 %v5708_v34, %v5705_v25  ;;  %v6324_v10 = vand.u32 4294901760, %v5554_v49  ;;  %v6329_v49 = vand.u32 4294901760, %v6294_v56 }
 0x102   :  { %2326 = vmatmul.mubr.f32.gmra.mrb[26].mxu1 %v5716_v44  ;;  %4052 = vmatpush3.bf16.msra.mxu0 %v4051_v37  ;;  %v6299_v37 = vld [vmem:[#allocation6_spill] sm:$0xff]  ;;  %v6304_v44 = vand.u32 4294901760, %v5332_v33  ;;  %v6308_v33 = vand.u32 4294901760, %v5407_v46 }
 0x103   :  { %4076 = vmatpush3.bf16.msra.mxu1 %v5418_v35  ;;  %4054 = vmatprep.subr.bf16.mxu0 %v4053_v14  ;;  %v2902_v14 = vld [vmem:[%s5954_s2] ss:$0 sm:$0xff] }
 0x104   :  { %4078 = vmatprep.subr.bf16.mxu1 %v6292_v22  ;;  %2577 = vmatprep.mubr.f32.mxu1 %v6293_v21  ;;  %v6301_v21 = vand.u32 4294901760, %v5300_v47  ;;  %v4103_v15 = vpack.c.bf16 %v6305_v45, %v6304_v44  ;;  %v6306_v47 = vand.u32 4294901760, %v5377_v23  ;;  %v4107_v45 = vpack.c.bf16 %v6309_v38, %v6308_v33 }
 0x105   :  { %v6310_v23 = vand.u32 4294901760, %v5426_v5  ;;  %v6332_v38 = vand.u32 4294901760, %v5663_v16  ;;  %v6336_v16 = vand.u32 4294901760, %v5731_v9 }
 0x106   :  { %4056 = vmatpush3.bf16.msra.mxu0 %v4055_v13  ;;  %v4067_v13 = vpack.c.bf16 %v5734_v32, %v5731_v9  ;;  %v6339_v9 = vld [vmem:[#allocation17_spill] sm:$0xff] }
 0x107   :  { %4080 = vmatpush3.bf16.msra.mxu1 %v6295_v31  ;;  %4058 = vmatprep.subr.bf16.mxu0 %v4057_v39  ;;  %v6300_v39 = vld [vmem:[#allocation7_spill] sm:$0xff] }
 0x108   :  { %4082 = vmatprep.subr.bf16.mxu1 %v6297_v28  ;;  %v2937_v41 = vpop.f32.mrb[0].mxu0 }
 0x109   :  { %v2938_v52 = vpop.f32.mrb[1].mxu0 }
 0x10a   :  { %4060 = vmatpush3.bf16.msra.mxu0 %v4059_v3  ;;  %v2939_v40 = vadd.f32 %v2938_v52, %v2937_v41  ;;  %v6302_v3 = vand.u32 4294901760, %v5302_v17  ;;  %v6303_v41 = vld [vmem:[#allocation12_spill] sm:$0xff]  ;;  %v6307_v17 = vand.u32 4294901760, %v5379_v53  ;;  %v6311_v53 = vand.u32 4294901760, %v5445_v26 }
 0x10b   :  { %4084 = vmatpush3.bf16.msra.mxu1 %v6298_v42  ;;  %4062 = vmatprep.subr.bf16.mxu0 %v4061_v11  ;;  %v6315_v26 = vand.u32 4294901760, %v5465_v51  ;;  %v6322_v51 = vand.u32 4294901760, %v5547_v7  ;;  %v6327_v7 = vand.u32 4294901760, %v6291_v50 }
 0x10c   :  { %4086 = vmatprep.subr.bf16.mxu1 %v6299_v37  ;;  %v4101_v11 = vpack.c.bf16 %v6302_v3, %v6301_v21  ;;  %v238_v52 = vadd.f32 %v2939_v40, %v2902_v14  ;;  %v6313_v3 = vand.u32 4294901760, %v5460_v43  ;;  %v6319_v43 = vand.u32 4294901760, %v6288_v48 }
 0x10d   :  { %v6325_v48 = vand.u32 4294901760, %v5575_v8 }
 0x10e   :  { %4064 = vmatpush3.bf16.msra.mxu0 %v4063_v20 }
 0x10f   :  { %4088 = vmatpush3.bf16.msra.mxu1 %v6300_v39  ;;  %4066 = vmatprep.subr.bf16.mxu0 %v4065_v55  ;;  %v4105_v55 = vpack.c.bf16 %v6307_v17, %v6306_v47 }
 0x110   :  { %4090 = vmatprep.subr.bf16.mxu1 %v6303_v41 }
 0x111   :  { %v2975_v30 = vpop.f32.mrb[0].mxu1 }
 0x112   :  { %v2976_v20 = vpop.f32.mrb[1].mxu1  ;;  %4068 = vmatpush3.bf16.msra.mxu0 %v4067_v13 }
 0x113   :  { %v2977_v32 = vadd.f32 %v2976_v20, %v2975_v30  ;;  %4092 = vmatpush3.bf16.msra.mxu1 %v5617_v6  ;;  %4102 = vmatprep.subr.bf16.mxu0 %v4101_v11  ;;  %v4111_v11 = vpack.c.bf16 %v6313_v3, %v6312_v19  ;;  %v6316_v20 = vand.u32 4294901760, %v5491_v59 }
 0x114   :  { %4094 = vmatprep.subr.bf16.mxu1 %v5639_v0 }
 0x115   :  { %v485_v40 = vadd.f32 %v2977_v32, %v238_v52  ;;  %2464 = vmatmul.mubr.f32.vlgmr.msra.gmra.mrb[28].mxu0 %v5714_v61  ;;  %v2978_v13 = vpop.f32.mrb[2].mxu1  ;;  %v4109_v32 = vpack.c.bf16 %v6311_v53, %v6310_v23  ;;  %v6314_v52 = vld [vmem:[#allocation10_spill] sm:$0xff]  ;;  %v4113_v47 = vpack.c.bf16 %v6316_v20, %v6315_v26  ;;  %v6337_v53 = vld [vmem:[#allocation20_spill] sm:$0xff] }
 0x116   :  { %4104 = vmatpush3.bf16.msra.mxu0 %v4103_v15  ;;  %2470 = vmatprep.mubr.f32.mxu0 %v5726_v2  ;;  %v2979_v44 = vpop.f32.mrb[3].mxu1 }
 0x117   :  { %4096 = vmatpush3.bf16.msra.mxu1 %v5661_v54  ;;  %4106 = vmatprep.subr.bf16.mxu0 %v4105_v55  ;;  %v2940_v30 = vpop.f32.mrb[2].mxu0  ;;  %v2980_v21 = vadd.f32 %v2979_v44, %v2978_v13  ;;  %v6317_v55 = vand.u32 4294901760, %v5714_v61  ;;  %v4115_v13 = vpack.c.bf16 %v6319_v43, %v6318_v60  ;;  %v6323_v61 = vand.u32 4294901760, %v5751_v24 }
 0x118   :  { %4098 = vmatprep.subr.bf16.mxu1 %v5747_v1  ;;  %v2941_v15 = vpop.f32.mrb[3].mxu0 }
 0x119   :  { %2473 = vmatmul.mubr.f32.gmra.mrb[30].mxu0 %v5751_v24  ;;  %v2942_v46 = vadd.f32 %v2941_v15, %v2940_v30  ;;  %v6328_v24 = vand.u32 4294901760, %v5619_v36  ;;  %v6333_v36 = vand.u32 4294901760, %v5677_v18  ;;  %v6338_v18 = vand.u32 4294901760, %v6337_v53  ;;  %v6340_v15 = vld [vmem:[#allocation18_spill] sm:$0xff] }
 0x11a   :  { %4108 = vmatpush3.bf16.msra.mxu0 %v4107_v45  ;;  %2758 = vmatprep.mubr.f32.mxu0 %v6314_v52 }
 0x11b   :  { %4100 = vmatpush3.bf16.msra.mxu1 %v5776_v27  ;;  %4110 = vmatprep.subr.bf16.mxu0 %v4109_v32  ;;  %v253_v5 = vadd.f32 %v2942_v46, %v2902_v14  ;;  %v6320_v14 = vand.u32 4294901760, %v5726_v2  ;;  %v6326_v2 = vand.u32 4294901760, %v5594_v58  ;;  %v6331_v58 = vand.u32 4294901760, %v5643_v62  ;;  %v6341_v46 = vld [vmem:[#allocation19_spill] sm:$0xff] }
 0x11c   :  { %4134 = vmatprep.subr.bf16.mxu1 %v5384_v29  ;;  %v6321_v29 = vand.u32 4294901760, %v5545_v4  ;;  %v4127_v56 = vpack.c.bf16 %v6333_v36, %v6332_v38  ;;  %v4131_v32 = vpack.c.bf16 %v6338_v18, %v6336_v16 }
 0x11d   :  { %v492_v17 = vadd.f32 %v2980_v21, %v253_v5  ;;  %v4121_v4 = vpack.c.bf16 %v6327_v7, %v6326_v2 }
 0x11e   :  { %2581 = vmatmul.mubr.f32.vlgmr.msra.gmra.mrb[28].mxu1 %v6317_v55  ;;  %4112 = vmatpush3.bf16.msra.mxu0 %v4111_v11  ;;  %v4117_v59 = vpack.c.bf16 %v6322_v51, %v6321_v29 }
 0x11f   :  { %4136 = vmatpush3.bf16.msra.mxu1 %v6289_v12  ;;  %2588 = vmatprep.mubr.f32.mxu1 %v6320_v14  ;;  %v4119_v12 = vpack.c.bf16 %v6325_v48, %v6324_v10 }
 0x120   :  { %4114 = vmatprep.subr.bf16.mxu0 %v4113_v47  ;;  %4138 = vmatprep.subr.bf16.mxu1 %v6290_v57  ;;  %v4123_v57 = vpack.c.bf16 %v6329_v49, %v6328_v24 }
 0x122   :  { %2592 = vmatmul.mubr.f32.gmra.mrb[30].mxu1 %v6323_v61  ;;  %4116 = vmatpush3.bf16.msra.mxu0 %v4115_v13 }
 0x123   :  { %4140 = vmatpush3.bf16.msra.mxu1 %v5418_v35  ;;  %4118 = vmatprep.subr.bf16.mxu0 %v4117_v59  ;;  %v6330_v35 = vand.u32 4294901760, %v6296_v63  ;;  %v6335_v63 = vand.u32 4294901760, %v5708_v34 }
 0x124   :  { %4142 = vmatprep.subr.bf16.mxu1 %v6292_v22  ;;  %2869 = vmatprep.mubr.f32.mxu1 %v6314_v52 }
 0x125   :  { %v4125_v8 = vpack.c.bf16 %v6331_v58, %v6330_v35 }
 0x126   :  { %4120 = vmatpush3.bf16.msra.mxu0 %v4119_v12 }
 0x127   :  { %4144 = vmatpush3.bf16.msra.mxu1 %v6295_v31  ;;  %4122 = vmatprep.subr.bf16.mxu0 %v4121_v4  ;;  %v6334_v31 = vand.u32 4294901760, %v5705_v25 }
 0x128   :  { %v3013_v50 = vpop.f32.mrb[4].mxu0  ;;  %4146 = vmatprep.subr.bf16.mxu1 %v6297_v28 }
 0x129   :  { %v3014_v22 = vpop.f32.mrb[5].mxu0  ;;  %v4129_v62 = vpack.c.bf16 %v6335_v63, %v6334_v31 }
 0x12a   :  { %v3015_v33 = vadd.f32 %v3014_v22, %v3013_v50  ;;  %4124 = vmatpush3.bf16.msra.mxu0 %v4123_v57 }
 0x12b   :  { %4148 = vmatpush3.bf16.msra.mxu1 %v6298_v42  ;;  %4126 = vmatprep.subr.bf16.mxu0 %v4125_v8 }
 0x12c   :  { %v630_v45 = vadd.f32 %v3015_v33, %v485_v40  ;;  %4150 = vmatprep.subr.bf16.mxu1 %v6299_v37  ;;  %v3016_v28 = vpop.f32.mrb[6].mxu0 }
 0x12d   :  { %v3017_v44 = vpop.f32.mrb[7].mxu0 }
 0x12e   :  { %4128 = vmatpush3.bf16.msra.mxu0 %v4127_v56  ;;  %v3018_v23 = vadd.f32 %v3017_v44, %v3016_v28 }
 0x12f   :  { %4152 = vmatpush3.bf16.msra.mxu1 %v6300_v39  ;;  %4130 = vmatprep.subr.bf16.mxu0 %v4129_v62 }
 0x130   :  { %v639_v42 = vadd.f32 %v3018_v23, %v492_v17  ;;  %4154 = vmatprep.subr.bf16.mxu1 %v6303_v41 }
 0x131   :  { %v3051_v34 = vpop.f32.mrb[4].mxu1 }
 0x132   :  { %v3052_v25 = vpop.f32.mrb[5].mxu1  ;;  %4132 = vmatpush3.bf16.msra.mxu0 %v4131_v32 }
 0x133   :  { %v3053_v40 = vadd.f32 %v3052_v25, %v3051_v34  ;;  %4156 = vmatpush3.bf16.msra.mxu1 %v5617_v6 }
 0x134   :  { %4158 = vmatprep.subr.bf16.mxu1 %v5639_v0 }
 0x135   :  { %v747_v37 = vadd.f32 %v3053_v40, %v630_v45  ;;  %v3054_v30 = vpop.f32.mrb[6].mxu1  ;;  %2760 = vmatmul.mubr.f32.vlgmr.msra.gmra.mrb[32].mxu0 %v6339_v9 }
 0x136   :  { %v3055_v21 = vpop.f32.mrb[7].mxu1  ;;  %2765 = vmatprep.mubr.f32.mxu0 %v6340_v15 }
 0x137   :  { %v3056_v39 = vadd.f32 %v3055_v21, %v3054_v30  ;;  %4160 = vmatpush3.bf16.msra.mxu1 %v5661_v54 }
 0x138   :  { %4162 = vmatprep.subr.bf16.mxu1 %v5747_v1 }
 0x139   :  { %v758_v41 = vadd.f32 %v3056_v39, %v639_v42  ;;  %2767 = vmatmul.mubr.f32.gmra.mrb[34].mxu0 %v6341_v46 }
 0x13b   :  { %4164 = vmatpush3.bf16.msra.mxu1 %v5776_v27 }
 0x13e   :  { %2871 = vmatmul.mubr.f32.vlgmr.msra.gmra.mrb[32].mxu1 %v6339_v9 }
 0x13f   :  { %2876 = vmatprep.mubr.f32.mxu1 %v6340_v15 }
 0x142   :  { %2878 = vmatmul.mubr.f32.gmra.mrb[34].mxu1 %v6341_v46 }
 0x148   :  { %v3089_v6 = vpop.f32.mrb[8].mxu0 }
 0x149   :  { %v3090_v0 = vpop.f32.mrb[9].mxu0 }
 0x14a   :  { %v3091_v19 = vadd.f32 %v3090_v0, %v3089_v6 }
 0x14c   :  { %v926_v3 = vadd.f32 %v3091_v19, %v747_v37  ;;  %v3092_v11 = vpop.f32.mrb[10].mxu0 }
 0x14d   :  { %v3093_v52 = vpop.f32.mrb[11].mxu0 }
 0x14e   :  { %v3094_v54 = vadd.f32 %v3093_v52, %v3092_v11 }
 0x150   :  { %v933_v5 = vadd.f32 %v3094_v54, %v758_v41 }
 0x151   :  { %v3127_v1 = vpop.f32.mrb[8].mxu1 }
 0x152   :  { %v3128_v26 = vpop.f32.mrb[9].mxu1 }
 0x153   :  { %v3129_v20 = vadd.f32 %v3128_v26, %v3127_v1 }
 0x155   :  { %v1037_v47 = vadd.f32 %v3129_v20, %v926_v3  ;;  %v3130_v17 = vpop.f32.mrb[10].mxu1 }
 0x156   :  { %v3131_v27 = vpop.f32.mrb[11].mxu1 }
 0x157   :  { %v3132_v55 = vadd.f32 %v3131_v27, %v3130_v17 }
 0x159   :  { %v1044_v60 = vadd.f32 %v3132_v55, %v933_v5 }
 0x168   :  { %v3165_v43 = vpop.f32.mrb[12].mxu0 }
 0x169   :  { %v3166_v13 = vpop.f32.mrb[13].mxu0 }
 0x16a   :  { %v3167_v14 = vadd.f32 %v3166_v13, %v3165_v43 }
 0x16c   :  { %v1156_v29 = vadd.f32 %v3167_v14, %v1037_v47  ;;  %v3168_v51 = vpop.f32.mrb[14].mxu0 }
 0x16d   :  { %v3169_v59 = vpop.f32.mrb[15].mxu0 }
 0x16e   :  { %v3170_v61 = vadd.f32 %v3169_v59, %v3168_v51 }
 0x170   :  { %v1171_v10 = vadd.f32 %v3170_v61, %v1044_v60 }
 0x171   :  { %v3203_v48 = vpop.f32.mrb[12].mxu1 }
 0x172   :  { %v3204_v12 = vpop.f32.mrb[13].mxu1 }
 0x173   :  { %v3205_v2 = vadd.f32 %v3204_v12, %v3203_v48 }
 0x175   :  { %v1403_v7 = vadd.f32 %v3205_v2, %v1156_v29  ;;  %v3206_v4 = vpop.f32.mrb[14].mxu1 }
 0x176   :  { %v3207_v24 = vpop.f32.mrb[15].mxu1 }
 0x177   :  { %v3208_v49 = vadd.f32 %v3207_v24, %v3206_v4 }
 0x179   :  { %v1410_v57 = vadd.f32 %v3208_v49, %v1171_v10 }
 0x188   :  { %v3241_v35 = vpop.f32.mrb[16].mxu0 }
 0x189   :  { %v3242_v58 = vpop.f32.mrb[17].mxu0 }
 0x18a   :  { %v3243_v8 = vadd.f32 %v3242_v58, %v3241_v35 }
 0x18c   :  { %v1548_v50 = vadd.f32 %v3243_v8, %v1403_v7  ;;  %v3244_v22 = vpop.f32.mrb[18].mxu0 }
 0x18d   :  { %v3245_v33 = vpop.f32.mrb[19].mxu0 }
 0x18e   :  { %v3246_v38 = vadd.f32 %v3245_v33, %v3244_v22 }
 0x190   :  { %v1557_v36 = vadd.f32 %v3246_v38, %v1410_v57 }
 0x191   :  { %v3279_v56 = vpop.f32.mrb[16].mxu1 }
 0x192   :  { %v3280_v31 = vpop.f32.mrb[17].mxu1 }
 0x193   :  { %v3281_v63 = vadd.f32 %v3280_v31, %v3279_v56 }
 0x195   :  { %v1665_v62 = vadd.f32 %v3281_v63, %v1548_v50  ;;  %v3282_v45 = vpop.f32.mrb[18].mxu1 }
 0x196   :  { %v3283_v28 = vpop.f32.mrb[19].mxu1 }
 0x197   :  { %v3284_v44 = vadd.f32 %v3283_v28, %v3282_v45 }
 0x199   :  { %v1676_v23 = vadd.f32 %v3284_v44, %v1557_v36 }
 0x1a8   :  { %v3317_v16 = vpop.f32.mrb[20].mxu0 }
 0x1a9   :  { %v3318_v53 = vpop.f32.mrb[21].mxu0 }
 0x1aa   :  { %v3319_v18 = vadd.f32 %v3318_v53, %v3317_v16 }
 0x1ac   :  { %v1844_v32 = vadd.f32 %v3319_v18, %v1665_v62  ;;  %v3320_v42 = vpop.f32.mrb[22].mxu0 }
 0x1ad   :  { %v3321_v34 = vpop.f32.mrb[23].mxu0 }
 0x1ae   :  { %v3322_v25 = vadd.f32 %v3321_v34, %v3320_v42 }
 0x1b0   :  { %v1851_v40 = vadd.f32 %v3322_v25, %v1676_v23 }
 0x1b1   :  { %v3355_v37 = vpop.f32.mrb[20].mxu1 }
 0x1b2   :  { %v3356_v30 = vpop.f32.mrb[21].mxu1 }
 0x1b3   :  { %v3357_v9 = vadd.f32 %v3356_v30, %v3355_v37 }
 0x1b5   :  { %v1955_v21 = vadd.f32 %v3357_v9, %v1844_v32  ;;  %v3358_v15 = vpop.f32.mrb[22].mxu1 }
 0x1b6   :  { %v3359_v39 = vpop.f32.mrb[23].mxu1 }
 0x1b7   :  { %v3360_v41 = vadd.f32 %v3359_v39, %v3358_v15 }
 0x1b9   :  { %v1962_v46 = vadd.f32 %v3360_v41, %v1851_v40 }
 0x1c8   :  { %v3393_v6 = vpop.f32.mrb[24].mxu0 }
 0x1c9   :  { %v3394_v0 = vpop.f32.mrb[25].mxu0 }
 0x1ca   :  { %v3395_v19 = vadd.f32 %v3394_v0, %v3393_v6 }
 0x1cc   :  { %v2074_v3 = vadd.f32 %v3395_v19, %v1955_v21  ;;  %v3396_v11 = vpop.f32.mrb[26].mxu0 }
 0x1cd   :  { %v3397_v52 = vpop.f32.mrb[27].mxu0 }
 0x1ce   :  { %v3398_v54 = vadd.f32 %v3397_v52, %v3396_v11 }
 0x1d0   :  { %v2089_v5 = vadd.f32 %v3398_v54, %v1962_v46 }
 0x1d1   :  { %v3431_v1 = vpop.f32.mrb[24].mxu1 }
 0x1d2   :  { %v3432_v26 = vpop.f32.mrb[25].mxu1 }
 0x1d3   :  { %v3433_v20 = vadd.f32 %v3432_v26, %v3431_v1 }
 0x1d5   :  { %v2321_v47 = vadd.f32 %v3433_v20, %v2074_v3  ;;  %v3434_v17 = vpop.f32.mrb[26].mxu1 }
 0x1d6   :  { %v3435_v27 = vpop.f32.mrb[27].mxu1 }
 0x1d7   :  { %v3436_v55 = vadd.f32 %v3435_v27, %v3434_v17 }
 0x1d9   :  { %v2328_v60 = vadd.f32 %v3436_v55, %v2089_v5 }
 0x1e8   :  { %v3469_v43 = vpop.f32.mrb[28].mxu0 }
 0x1e9   :  { %v3470_v13 = vpop.f32.mrb[29].mxu0 }
 0x1ea   :  { %v3471_v14 = vadd.f32 %v3470_v13, %v3469_v43 }
 0x1ec   :  { %v2466_v29 = vadd.f32 %v3471_v14, %v2321_v47  ;;  %v3472_v51 = vpop.f32.mrb[30].mxu0 }
 0x1ed   :  { %v3473_v59 = vpop.f32.mrb[31].mxu0 }
 0x1ee   :  { %v3474_v61 = vadd.f32 %v3473_v59, %v3472_v51 }
 0x1f0   :  { %v2475_v10 = vadd.f32 %v3474_v61, %v2328_v60 }
 0x1f1   :  { %v3507_v48 = vpop.f32.mrb[28].mxu1 }
 0x1f2   :  { %v3508_v12 = vpop.f32.mrb[29].mxu1 }
 0x1f3   :  { %v3509_v2 = vadd.f32 %v3508_v12, %v3507_v48 }
 0x1f5   :  { %v2583_v7 = vadd.f32 %v3509_v2, %v2466_v29  ;;  %v3510_v4 = vpop.f32.mrb[30].mxu1 }
 0x1f6   :  { %v3511_v24 = vpop.f32.mrb[31].mxu1 }
 0x1f7   :  { %v3512_v49 = vadd.f32 %v3511_v24, %v3510_v4 }
 0x1f9   :  { %v2594_v57 = vadd.f32 %v3512_v49, %v2475_v10 }
 0x208   :  { %v3545_v35 = vpop.f32.mrb[32].mxu0 }
 0x209   :  { %v3546_v58 = vpop.f32.mrb[33].mxu0 }
 0x20a   :  { %v3547_v8 = vadd.f32 %v3546_v58, %v3545_v35 }
 0x20c   :  { %v2762_v50 = vadd.f32 %v3547_v8, %v2583_v7  ;;  %v3548_v22 = vpop.f32.mrb[34].mxu0 }
 0x20d   :  { %v3549_v33 = vpop.f32.mrb[35].mxu0 }
 0x20e   :  { %v3550_v38 = vadd.f32 %v3549_v33, %v3548_v22 }
 0x210   :  { %v2769_v36 = vadd.f32 %v3550_v38, %v2594_v57 }
 0x211   :  { %v3583_v56 = vpop.f32.mrb[32].mxu1 }
 0x212   :  { %v3584_v31 = vpop.f32.mrb[33].mxu1 }
 0x213   :  { %v3585_v63 = vadd.f32 %v3584_v31, %v3583_v56 }
 0x215   :  { %v2873_v62 = vadd.f32 %v3585_v63, %v2762_v50  ;;  %v3586_v45 = vpop.f32.mrb[34].mxu1 }
 0x216   :  { %v3587_v28 = vpop.f32.mrb[35].mxu1 }
 0x217   :  { %v2903_v44 = vmul.f32 -1.442695, %v2873_v62  ;;  %v3588_v23 = vadd.f32 %v3587_v28, %v3586_v45 }
 0x219   :  { %4165 = vpow2.f32 %v2903_v44  ;;  %v2880_v16 = vadd.f32 %v3588_v23, %v2769_v36 }
 0x21b   :  { %v2904_v53 = vmul.f32 -1.442695, %v2880_v16 }
 0x21d   :  { %4167 = vpow2.f32 %v2904_v53 }
 0x223   :  { %v4166_v18 = vpop.eup %4165 }
 0x224   :  { %v2889_v32 = vadd.f32 1.0, %v4166_v18 }
 0x226   :  { %4169 = vrcp.f32 %v2889_v32 }
 0x227   :  { %v4168_v42 = vpop.eup %4167 }
 0x228   :  { %v2890_v34 = vadd.f32 1.0, %v4168_v42 }
 0x22a   :  { %4171 = vrcp.f32 %v2890_v34 }
 0x230   :  { %v4170_v25 = vpop.eup %4169 }
 0x231   :  { %2896 = vst.msk [vmem:[%s5955_s3] sm:$0xff] %vm2895_vm0, %v4170_v25 }
 0x234   :  { %v4172_v40 = vpop.eup %4171 }
 0x235   :  { %2897 = vst.msk [vmem:[%s5955_s3 + $0x8] sm:$0xff] %vm2895_vm0, %v4172_v40 }

</bundles_post_ra>
